<compile_context>
chip_gen: v5e
topology: v5e:2x2
jax: 0.10.0
libtpu: 0.0.40
codegen_flags: <defaults>
</compile_context>

<pallas_src>
import functools
import math

import jax
import jax.numpy as jnp
from jax.experimental import pallas as pl
from jax.experimental.pallas import tpu as pltpu
from jax.scipy.special import erf

_HAS_BUFFERED = hasattr(pl, "Buffered")


def _round_up(x, m):
    return ((x + m - 1) // m) * m


def _gelu_exact(x):
    # matches torch.nn.GELU() default (erf variant)
    return 0.5 * x * (1.0 + erf(x * (1.0 / math.sqrt(2.0))))


def _gelu_tanh(x):
    # tanh approximation (EUP-friendly); changes numerics vs torch default.
    c = math.sqrt(2.0 / math.pi)
    return 0.5 * x * (1.0 + jnp.tanh(c * (x + 0.044715 * x * x * x)))


def _layernorm(x, gamma, beta, eps=1e-5):
    mu = jnp.mean(x, axis=-1, keepdims=True)
    var = jnp.mean((x - mu) ** 2, axis=-1, keepdims=True)
    return (x - mu) * jax.lax.rsqrt(var + eps) * gamma + beta


def mlp_kernel(x_ref,
               w1_ref, b1_ref, g1_ref, be1_ref,
               w2_ref, b2_ref, g2_ref, be2_ref,
               w3_ref, b3_ref,
               o_ref, *, approximate_gelu=False):
    act = _gelu_tanh if approximate_gelu else _gelu_exact

    x = x_ref[...]  # already in the matmul dtype (f32 or bf16) - no extra cast

    # fc1 -> ln1 -> gelu   (dot accumulates in f32; LN/GELU in f32)
    h = jnp.dot(x, w1_ref[...], preferred_element_type=jnp.float32) + b1_ref[...]
    h = act(_layernorm(h, g1_ref[...], be1_ref[...]))

    # fc2 -> ln2 -> gelu
    h = h.astype(w2_ref.dtype)  # no-op in the f32 path
    h = jnp.dot(h, w2_ref[...], preferred_element_type=jnp.float32) + b2_ref[...]
    h = act(_layernorm(h, g2_ref[...], be2_ref[...]))

    # fc3 (output columns padded to a lane-dense width; pad cols are exactly 0)
    h = h.astype(w3_ref.dtype)
    out = jnp.dot(h, w3_ref[...], preferred_element_type=jnp.float32) + b3_ref[...]
    o_ref[...] = out.astype(o_ref.dtype)


def _choose_tile_b(B):
    """Target 512-1024 rows/step; keep >=2 grid steps for large B (v7x 2-TC)."""
    tile = min(B, 1024)
    if B >= 1024:
        tile = min(tile, _round_up((B + 1) // 2, 16))
    return _round_up(max(tile, 1), 16)


def _vmem_limit_bytes(tile_b, D, n_out_pad, x_itemsize, out_itemsize, param_bytes):
    x_tile = tile_b * D * x_itemsize
    out_tile = tile_b * n_out_pad * out_itemsize
    # double-buffered x/out tiles + (up to) double-buffered params + f32 temps
    est = 2 * (x_tile + out_tile) + 2 * param_bytes
    est += 4 * tile_b * max(D, n_out_pad) * 4
    # >= default scoped limit, but well under v7x's 64 MiB physical VMEM.
    return int(min(max(2 * est, 32 << 20), 48 << 20))


def mlp_forward(x, params, *, tile_b=None, matmul_dtype=None,
                approximate_gelu=False):
    """x: [B, in_features].  params: dict of pre-transposed weights / 2-D params."""
    B, D = x.shape
    n_class = params["w3"].shape[1]
    out_dtype = x.dtype

    mm_dtype = jnp.dtype(matmul_dtype) if matmul_dtype is not None else jnp.dtype(x.dtype)

    # --- lane-dense output: pad n_class up to a multiple of 128 -------------
    n_pad = max(_round_up(n_class, 128), 128)
    w3 = params["w3"].astype(mm_dtype)
    b3 = params["b3"]
    if n_pad != n_class:
        w3 = jnp.pad(w3, ((0, 0), (0, n_pad - n_class)))
        b3 = jnp.pad(b3, ((0, 0), (0, n_pad - n_class)))

    # --- cast matmul operands; LN/GELU params & biases stay f32 -------------
    xk = x.astype(mm_dtype)
    w1 = params["w1"].astype(mm_dtype)
    w2 = params["w2"].astype(mm_dtype)

    # --- batch tiling (multiple of 16; pad B up to a tile multiple) ---------
    if tile_b is None:
        tile_b = _choose_tile_b(B)
    tile_b = min(_round_up(tile_b, 16), _round_up(B, 16))
    B_pad = _round_up(B, tile_b)
    if B_pad != B:
        xk = jnp.pad(xk, ((0, B_pad - B), (0, 0)))
    grid = (B_pad // tile_b,)

    param_list = [w1, params["b1"], params["g1"], params["be1"],
                  w2, params["b2"], params["g2"], params["be2"],
                  w3, b3]
    param_bytes = sum(int(p.size) * jnp.dtype(p.dtype).itemsize for p in param_list)

    vmem_limit = _vmem_limit_bytes(tile_b, D, n_pad, mm_dtype.itemsize,
                                   jnp.dtype(out_dtype).itemsize, param_bytes)

    kernel = functools.partial(mlp_kernel, approximate_gelu=approximate_gelu)

    def _const_spec(p, single_buffer):
        # Params are constant across the grid; single-buffer them when the
        # installed JAX exposes pipeline_mode (frees VMEM / DMA descriptors).
        kwargs = {}
        if single_buffer:
            kwargs["pipeline_mode"] = pl.Buffered(1)
        return pl.BlockSpec(p.shape, lambda i: (0, 0), **kwargs)

    def run(single_buffer_params):
        in_specs = [pl.BlockSpec((tile_b, D), lambda i: (i, 0))]
        in_specs += [_const_spec(p, single_buffer_params) for p in param_list]
        return pl.pallas_call(
            kernel,
            out_shape=jax.ShapeDtypeStruct((B_pad, n_pad), out_dtype),
            grid_spec=pltpu.PrefetchScalarGridSpec(
                num_scalar_prefetch=0,
                grid=grid,
                in_specs=in_specs,
                out_specs=pl.BlockSpec((tile_b, n_pad), lambda i: (i, 0)),
            ),
            compiler_params=pltpu.CompilerParams(
                dimension_semantics=("parallel",),
                vmem_limit_bytes=vmem_limit),
        )(xk, *param_list)

    if _HAS_BUFFERED:
        try:
            out_pad = run(True)
        except Exception:  # older JAX / unsupported Buffered(1): default buffering
            out_pad = run(False)
    else:
        out_pad = run(False)

    return out_pad[:B, :n_class]


def init_params(key, in_features, n_class, dtype=jnp.float32):
    """Deterministic init mimicking torch defaults (U(-1/sqrt(fan_in), +...))."""
    h1 = in_features // 4
    h2 = in_features // 16

    def linear(key, fan_in, fan_out):
        kw, kb = jax.random.split(key)
        bound = 1.0 / math.sqrt(fan_in)
        w = jax.random.uniform(kw, (fan_in, fan_out), dtype, -bound, bound)  # pre-transposed
        b = jax.random.uniform(kb, (1, fan_out), dtype, -bound, bound)
        return w, b

    k1, k2, k3 = jax.random.split(key, 3)
    w1, b1 = linear(k1, in_features, h1)
    w2, b2 = linear(k2, h1, h2)
    w3, b3 = linear(k3, h2, n_class)
    return {
        "w1": w1, "b1": b1, "g1": jnp.ones((1, h1), dtype), "be1": jnp.zeros((1, h1), dtype),
        "w2": w2, "b2": b2, "g2": jnp.ones((1, h2), dtype), "be2": jnp.zeros((1, h2), dtype),
        "w3": w3, "b3": b3,
    }


def mlp_reference(x, p):
    """Pure-JAX reference (same math as the PyTorch module, drop=0)."""
    h = x @ p["w1"] + p["b1"]
    h = _gelu_exact(_layernorm(h, p["g1"], p["be1"]))
    h = h @ p["w2"] + p["b2"]
    h = _gelu_exact(_layernorm(h, p["g2"], p["be2"]))
    return h @ p["w3"] + p["b3"]


if __name__ == "__main__":
    in_features = 256   # -> hidden1 = 64, hidden2 = 16
    n_class = 10
    batch = 16

    key = jax.random.PRNGKey(0)
    kx, kp = jax.random.split(key)
    x = jax.random.normal(kx, (batch, in_features), jnp.float32)
    params = init_params(kp, in_features, n_class)
    ref = mlp_reference(x, params)

    # f32 path (matches torch numerics; toy batch -> grid=(1,))
    out = jax.block_until_ready(mlp_forward(x, params))
    assert out.shape == (batch, n_class)
    assert jnp.allclose(out, ref, rtol=1e-5, atol=1e-5), "f32 mismatch vs reference"

    # bf16 matmul path (v6e/v7x MXU datapath); LN/GELU still f32
    out_bf16 = jax.block_until_ready(mlp_forward(x, params, matmul_dtype=jnp.bfloat16))
    assert out_bf16.shape == (batch, n_class)
    assert jnp.allclose(out_bf16, ref, rtol=5e-2, atol=5e-2), "bf16 mismatch vs reference"

    # batch not a multiple of the tile -> exercises batch padding path
    out_ragged = jax.block_until_ready(mlp_forward(x[:12], params))
    assert out_ragged.shape == (12, n_class)
    assert jnp.allclose(out_ragged, ref[:12], rtol=1e-5, atol=1e-5), "ragged-batch mismatch"

    print("KERNEL_OK")
</pallas_src>

<mosaic_0001>
module attributes {stable_mosaic.version = 11 : i64} {
  func.func @mlp_kernel(%arg0: i32, %arg1: memref<16x256xf32, #tpu.memory_space<vmem>>, %arg2: memref<256x64xf32, #tpu.memory_space<vmem>>, %arg3: memref<1x64xf32, #tpu.memory_space<vmem>>, %arg4: memref<1x64xf32, #tpu.memory_space<vmem>>, %arg5: memref<1x64xf32, #tpu.memory_space<vmem>>, %arg6: memref<64x16xf32, #tpu.memory_space<vmem>>, %arg7: memref<1x16xf32, #tpu.memory_space<vmem>>, %arg8: memref<1x16xf32, #tpu.memory_space<vmem>>, %arg9: memref<1x16xf32, #tpu.memory_space<vmem>>, %arg10: memref<16x128xf32, #tpu.memory_space<vmem>>, %arg11: memref<1x128xf32, #tpu.memory_space<vmem>>, %arg12: memref<16x128xf32, #tpu.memory_space<vmem>>) attributes {dimension_semantics = [#tpu.dimension_semantics<parallel>], iteration_bounds = array<i64: 1>, scalar_prefetch = 0 : i64, scratch_operands = 0 : i64, tpu.core_type = #tpu.core_type<tc>, window_params = [{transform_indices = @transform_0, window_bounds = array<i64: 16, 256>}, {pipeline_mode = #tpu.pipeline_mode<synchronous>, transform_indices = @transform_1, window_bounds = array<i64: 256, 64>}, {pipeline_mode = #tpu.pipeline_mode<synchronous>, transform_indices = @transform_2, window_bounds = array<i64: 1, 64>}, {pipeline_mode = #tpu.pipeline_mode<synchronous>, transform_indices = @transform_3, window_bounds = array<i64: 1, 64>}, {pipeline_mode = #tpu.pipeline_mode<synchronous>, transform_indices = @transform_4, window_bounds = array<i64: 1, 64>}, {pipeline_mode = #tpu.pipeline_mode<synchronous>, transform_indices = @transform_5, window_bounds = array<i64: 64, 16>}, {pipeline_mode = #tpu.pipeline_mode<synchronous>, transform_indices = @transform_6, window_bounds = array<i64: 1, 16>}, {pipeline_mode = #tpu.pipeline_mode<synchronous>, transform_indices = @transform_7, window_bounds = array<i64: 1, 16>}, {pipeline_mode = #tpu.pipeline_mode<synchronous>, transform_indices = @transform_8, window_bounds = array<i64: 1, 16>}, {pipeline_mode = #tpu.pipeline_mode<synchronous>, transform_indices = @transform_9, window_bounds = array<i64: 16, 128>}, {pipeline_mode = #tpu.pipeline_mode<synchronous>, transform_indices = @transform_10, window_bounds = array<i64: 1, 128>}, {transform_indices = @transform_11, window_bounds = array<i64: 16, 128>}]} {
    %c0 = arith.constant 0 : index
    %c0_0 = arith.constant 0 : index
    %0 = vector.load %arg1[%c0, %c0_0] : memref<16x256xf32, #tpu.memory_space<vmem>>, vector<16x256xf32>
    %c0_1 = arith.constant 0 : index
    %c0_2 = arith.constant 0 : index
    %1 = vector.load %arg2[%c0_1, %c0_2] : memref<256x64xf32, #tpu.memory_space<vmem>>, vector<256x64xf32>
    %cst = arith.constant dense<0.000000e+00> : vector<16x64xf32>
    %2 = tpu.matmul %0, %1, %cst {dimension_numbers = #tpu.dot_dimension_numbers<[1], [0], [0], [1], [0, 0, 1, 1], [], []>} : vector<16x256xf32>, vector<256x64xf32>, vector<16x64xf32> -> vector<16x64xf32>
    %c0_3 = arith.constant 0 : index
    %c0_4 = arith.constant 0 : index
    %3 = vector.load %arg3[%c0_3, %c0_4] : memref<1x64xf32, #tpu.memory_space<vmem>>, vector<1x64xf32>
    %4 = vector.broadcast %3 : vector<1x64xf32> to vector<16x64xf32>
    %5 = arith.addf %2, %4 : vector<16x64xf32>
    %c0_5 = arith.constant 0 : index
    %c0_6 = arith.constant 0 : index
    %6 = vector.load %arg4[%c0_5, %c0_6] : memref<1x64xf32, #tpu.memory_space<vmem>>, vector<1x64xf32>
    %c0_7 = arith.constant 0 : index
    %c0_8 = arith.constant 0 : index
    %7 = vector.load %arg5[%c0_7, %c0_8] : memref<1x64xf32, #tpu.memory_space<vmem>>, vector<1x64xf32>
    %cst_9 = arith.constant dense<0.000000e+00> : vector<16xf32>
    %8 = vector.multi_reduction <add>, %5, %cst_9 [1] : vector<16x64xf32> to vector<16xf32>
    %9 = vector.shape_cast %8 : vector<16xf32> to vector<16x1xf32>
    %cst_10 = arith.constant 6.400000e+01 : f32
    %10 = vector.broadcast %cst_10 : f32 to vector<16x1xf32>
    %11 = arith.divf %9, %10 : vector<16x1xf32>
    %12 = vector.broadcast %11 : vector<16x1xf32> to vector<16x64xf32>
    %13 = arith.subf %5, %12 : vector<16x64xf32>
    %14 = arith.mulf %13, %13 : vector<16x64xf32>
    %cst_11 = arith.constant dense<0.000000e+00> : vector<16xf32>
    %15 = vector.multi_reduction <add>, %14, %cst_11 [1] : vector<16x64xf32> to vector<16xf32>
    %16 = vector.shape_cast %15 : vector<16xf32> to vector<16x1xf32>
    %cst_12 = arith.constant 6.400000e+01 : f32
    %17 = vector.broadcast %cst_12 : f32 to vector<16x1xf32>
    %18 = arith.divf %16, %17 : vector<16x1xf32>
    %19 = vector.broadcast %11 : vector<16x1xf32> to vector<16x64xf32>
    %20 = arith.subf %5, %19 : vector<16x64xf32>
    %cst_13 = arith.constant 9.99999974E-6 : f32
    %21 = vector.broadcast %cst_13 : f32 to vector<16x1xf32>
    %22 = arith.addf %18, %21 : vector<16x1xf32>
    %23 = math.rsqrt %22 : vector<16x1xf32>
    %24 = vector.broadcast %23 : vector<16x1xf32> to vector<16x64xf32>
    %25 = arith.mulf %20, %24 : vector<16x64xf32>
    %26 = vector.broadcast %6 : vector<1x64xf32> to vector<16x64xf32>
    %27 = arith.mulf %25, %26 : vector<16x64xf32>
    %28 = vector.broadcast %7 : vector<1x64xf32> to vector<16x64xf32>
    %29 = arith.addf %27, %28 : vector<16x64xf32>
    %cst_14 = arith.constant 5.000000e-01 : f32
    %30 = vector.broadcast %cst_14 : f32 to vector<16x64xf32>
    %31 = arith.mulf %30, %29 : vector<16x64xf32>
    %cst_15 = arith.constant 0.707106769 : f32
    %32 = vector.broadcast %cst_15 : f32 to vector<16x64xf32>
    %33 = arith.mulf %29, %32 : vector<16x64xf32>
    %34 = math.erf %33 : vector<16x64xf32>
    %cst_16 = arith.constant 1.000000e+00 : f32
    %35 = vector.broadcast %cst_16 : f32 to vector<16x64xf32>
    %36 = arith.addf %35, %34 : vector<16x64xf32>
    %37 = arith.mulf %31, %36 : vector<16x64xf32>
    %c0_17 = arith.constant 0 : index
    %c0_18 = arith.constant 0 : index
    %38 = vector.load %arg6[%c0_17, %c0_18] : memref<64x16xf32, #tpu.memory_space<vmem>>, vector<64x16xf32>
    %cst_19 = arith.constant dense<0.000000e+00> : vector<16x16xf32>
    %39 = tpu.matmul %37, %38, %cst_19 {dimension_numbers = #tpu.dot_dimension_numbers<[1], [0], [0], [1], [0, 0, 1, 1], [], []>} : vector<16x64xf32>, vector<64x16xf32>, vector<16x16xf32> -> vector<16x16xf32>
    %c0_20 = arith.constant 0 : index
    %c0_21 = arith.constant 0 : index
    %40 = vector.load %arg7[%c0_20, %c0_21] : memref<1x16xf32, #tpu.memory_space<vmem>>, vector<1x16xf32>
    %41 = vector.broadcast %40 : vector<1x16xf32> to vector<16x16xf32>
    %42 = arith.addf %39, %41 : vector<16x16xf32>
    %c0_22 = arith.constant 0 : index
    %c0_23 = arith.constant 0 : index
    %43 = vector.load %arg8[%c0_22, %c0_23] : memref<1x16xf32, #tpu.memory_space<vmem>>, vector<1x16xf32>
    %c0_24 = arith.constant 0 : index
    %c0_25 = arith.constant 0 : index
    %44 = vector.load %arg9[%c0_24, %c0_25] : memref<1x16xf32, #tpu.memory_space<vmem>>, vector<1x16xf32>
    %cst_26 = arith.constant dense<0.000000e+00> : vector<16xf32>
    %45 = vector.multi_reduction <add>, %42, %cst_26 [1] : vector<16x16xf32> to vector<16xf32>
    %46 = vector.shape_cast %45 : vector<16xf32> to vector<16x1xf32>
    %cst_27 = arith.constant 1.600000e+01 : f32
    %47 = vector.broadcast %cst_27 : f32 to vector<16x1xf32>
    %48 = arith.divf %46, %47 : vector<16x1xf32>
    %49 = vector.broadcast %48 : vector<16x1xf32> to vector<16x16xf32>
    %50 = arith.subf %42, %49 : vector<16x16xf32>
    %51 = arith.mulf %50, %50 : vector<16x16xf32>
    %cst_28 = arith.constant dense<0.000000e+00> : vector<16xf32>
    %52 = vector.multi_reduction <add>, %51, %cst_28 [1] : vector<16x16xf32> to vector<16xf32>
    %53 = vector.shape_cast %52 : vector<16xf32> to vector<16x1xf32>
    %cst_29 = arith.constant 1.600000e+01 : f32
    %54 = vector.broadcast %cst_29 : f32 to vector<16x1xf32>
    %55 = arith.divf %53, %54 : vector<16x1xf32>
    %56 = vector.broadcast %48 : vector<16x1xf32> to vector<16x16xf32>
    %57 = arith.subf %42, %56 : vector<16x16xf32>
    %cst_30 = arith.constant 9.99999974E-6 : f32
    %58 = vector.broadcast %cst_30 : f32 to vector<16x1xf32>
    %59 = arith.addf %55, %58 : vector<16x1xf32>
    %60 = math.rsqrt %59 : vector<16x1xf32>
    %61 = vector.broadcast %60 : vector<16x1xf32> to vector<16x16xf32>
    %62 = arith.mulf %57, %61 : vector<16x16xf32>
    %63 = vector.broadcast %43 : vector<1x16xf32> to vector<16x16xf32>
    %64 = arith.mulf %62, %63 : vector<16x16xf32>
    %65 = vector.broadcast %44 : vector<1x16xf32> to vector<16x16xf32>
    %66 = arith.addf %64, %65 : vector<16x16xf32>
    %cst_31 = arith.constant 5.000000e-01 : f32
    %67 = vector.broadcast %cst_31 : f32 to vector<16x16xf32>
    %68 = arith.mulf %67, %66 : vector<16x16xf32>
    %cst_32 = arith.constant 0.707106769 : f32
    %69 = vector.broadcast %cst_32 : f32 to vector<16x16xf32>
    %70 = arith.mulf %66, %69 : vector<16x16xf32>
    %71 = math.erf %70 : vector<16x16xf32>
    %cst_33 = arith.constant 1.000000e+00 : f32
    %72 = vector.broadcast %cst_33 : f32 to vector<16x16xf32>
    %73 = arith.addf %72, %71 : vector<16x16xf32>
    %74 = arith.mulf %68, %73 : vector<16x16xf32>
    %c0_34 = arith.constant 0 : index
    %c0_35 = arith.constant 0 : index
    %75 = vector.load %arg10[%c0_34, %c0_35] : memref<16x128xf32, #tpu.memory_space<vmem>>, vector<16x128xf32>
    %cst_36 = arith.constant dense<0.000000e+00> : vector<16x128xf32>
    %76 = tpu.matmul %74, %75, %cst_36 {dimension_numbers = #tpu.dot_dimension_numbers<[1], [0], [0], [1], [0, 0, 1, 1], [], []>} : vector<16x16xf32>, vector<16x128xf32>, vector<16x128xf32> -> vector<16x128xf32>
    %c0_37 = arith.constant 0 : index
    %c0_38 = arith.constant 0 : index
    %77 = vector.load %arg11[%c0_37, %c0_38] : memref<1x128xf32, #tpu.memory_space<vmem>>, vector<1x128xf32>
    %78 = vector.broadcast %77 : vector<1x128xf32> to vector<16x128xf32>
    %79 = arith.addf %76, %78 : vector<16x128xf32>
    %c0_39 = arith.constant 0 : index
    %c0_40 = arith.constant 0 : index
    %80 = vector.load %arg12[%c0_39, %c0_40] : memref<16x128xf32, #tpu.memory_space<vmem>>, vector<16x128xf32>
    tpu.vector_store %arg12[%c0_39, %c0_40], %79 {strides = array<i32>} : memref<16x128xf32, #tpu.memory_space<vmem>>, vector<16x128xf32>,
    return
  }
  func.func @transform_0(%arg0: i32) -> (i32, i32) {
    %c0_i32 = arith.constant 0 : i32
    %c0_i32_0 = arith.constant 0 : i32
    return %arg0, %c0_i32 : i32, i32
  }
  func.func @transform_1(%arg0: i32) -> (i32, i32) {
    %c0_i32 = arith.constant 0 : i32
    %c0_i32_0 = arith.constant 0 : i32
    %c0_i32_1 = arith.constant 0 : i32
    return %c0_i32, %c0_i32_0 : i32, i32
  }
  func.func @transform_2(%arg0: i32) -> (i32, i32) {
    %c0_i32 = arith.constant 0 : i32
    %c0_i32_0 = arith.constant 0 : i32
    %c0_i32_1 = arith.constant 0 : i32
    return %c0_i32, %c0_i32_0 : i32, i32
  }
  func.func @transform_3(%arg0: i32) -> (i32, i32) {
    %c0_i32 = arith.constant 0 : i32
    %c0_i32_0 = arith.constant 0 : i32
    %c0_i32_1 = arith.constant 0 : i32
    return %c0_i32, %c0_i32_0 : i32, i32
  }
  func.func @transform_4(%arg0: i32) -> (i32, i32) {
    %c0_i32 = arith.constant 0 : i32
    %c0_i32_0 = arith.constant 0 : i32
    %c0_i32_1 = arith.constant 0 : i32
    return %c0_i32, %c0_i32_0 : i32, i32
  }
  func.func @transform_5(%arg0: i32) -> (i32, i32) {
    %c0_i32 = arith.constant 0 : i32
    %c0_i32_0 = arith.constant 0 : i32
    %c0_i32_1 = arith.constant 0 : i32
    return %c0_i32, %c0_i32_0 : i32, i32
  }
  func.func @transform_6(%arg0: i32) -> (i32, i32) {
    %c0_i32 = arith.constant 0 : i32
    %c0_i32_0 = arith.constant 0 : i32
    %c0_i32_1 = arith.constant 0 : i32
    return %c0_i32, %c0_i32_0 : i32, i32
  }
  func.func @transform_7(%arg0: i32) -> (i32, i32) {
    %c0_i32 = arith.constant 0 : i32
    %c0_i32_0 = arith.constant 0 : i32
    %c0_i32_1 = arith.constant 0 : i32
    return %c0_i32, %c0_i32_0 : i32, i32
  }
  func.func @transform_8(%arg0: i32) -> (i32, i32) {
    %c0_i32 = arith.constant 0 : i32
    %c0_i32_0 = arith.constant 0 : i32
    %c0_i32_1 = arith.constant 0 : i32
    return %c0_i32, %c0_i32_0 : i32, i32
  }
  func.func @transform_9(%arg0: i32) -> (i32, i32) {
    %c0_i32 = arith.constant 0 : i32
    %c0_i32_0 = arith.constant 0 : i32
    %c0_i32_1 = arith.constant 0 : i32
    return %c0_i32, %c0_i32_0 : i32, i32
  }
  func.func @transform_10(%arg0: i32) -> (i32, i32) {
    %c0_i32 = arith.constant 0 : i32
    %c0_i32_0 = arith.constant 0 : i32
    %c0_i32_1 = arith.constant 0 : i32
    return %c0_i32, %c0_i32_0 : i32, i32
  }
  func.func @transform_11(%arg0: i32) -> (i32, i32) {
    %c0_i32 = arith.constant 0 : i32
    %c0_i32_0 = arith.constant 0 : i32
    return %arg0, %c0_i32 : i32, i32
  }
}

module attributes {stable_mosaic.version = 11 : i64} {
  func.func @mlp_kernel(%arg0: i32, %arg1: memref<16x256xf32, #tpu.memory_space<vmem>>, %arg2: memref<256x64xf32, #tpu.memory_space<vmem>>, %arg3: memref<1x64xf32, #tpu.memory_space<vmem>>, %arg4: memref<1x64xf32, #tpu.memory_space<vmem>>, %arg5: memref<1x64xf32, #tpu.memory_space<vmem>>, %arg6: memref<64x16xf32, #tpu.memory_space<vmem>>, %arg7: memref<1x16xf32, #tpu.memory_space<vmem>>, %arg8: memref<1x16xf32, #tpu.memory_space<vmem>>, %arg9: memref<1x16xf32, #tpu.memory_space<vmem>>, %arg10: memref<16x128xf32, #tpu.memory_space<vmem>>, %arg11: memref<1x128xf32, #tpu.memory_space<vmem>>, %arg12: memref<16x128xf32, #tpu.memory_space<vmem>>) attributes {dimension_semantics = [#tpu.dimension_semantics<parallel>], iteration_bounds = array<i64: 1>, scalar_prefetch = 0 : i64, scratch_operands = 0 : i64, tpu.core_type = #tpu.core_type<tc>, window_params = [{transform_indices = @transform_0, window_bounds = array<i64: 16, 256>}, {pipeline_mode = #tpu.pipeline_mode<synchronous>, transform_indices = @transform_1, window_bounds = array<i64: 256, 64>}, {pipeline_mode = #tpu.pipeline_mode<synchronous>, transform_indices = @transform_2, window_bounds = array<i64: 1, 64>}, {pipeline_mode = #tpu.pipeline_mode<synchronous>, transform_indices = @transform_3, window_bounds = array<i64: 1, 64>}, {pipeline_mode = #tpu.pipeline_mode<synchronous>, transform_indices = @transform_4, window_bounds = array<i64: 1, 64>}, {pipeline_mode = #tpu.pipeline_mode<synchronous>, transform_indices = @transform_5, window_bounds = array<i64: 64, 16>}, {pipeline_mode = #tpu.pipeline_mode<synchronous>, transform_indices = @transform_6, window_bounds = array<i64: 1, 16>}, {pipeline_mode = #tpu.pipeline_mode<synchronous>, transform_indices = @transform_7, window_bounds = array<i64: 1, 16>}, {pipeline_mode = #tpu.pipeline_mode<synchronous>, transform_indices = @transform_8, window_bounds = array<i64: 1, 16>}, {pipeline_mode = #tpu.pipeline_mode<synchronous>, transform_indices = @transform_9, window_bounds = array<i64: 16, 128>}, {pipeline_mode = #tpu.pipeline_mode<synchronous>, transform_indices = @transform_10, window_bounds = array<i64: 1, 128>}, {transform_indices = @transform_11, window_bounds = array<i64: 16, 128>}]} {
    %c0 = arith.constant 0 : index
    %c0_0 = arith.constant 0 : index
    %0 = vector.load %arg1[%c0, %c0_0] : memref<16x256xf32, #tpu.memory_space<vmem>>, vector<16x256xf32>
    %c0_1 = arith.constant 0 : index
    %c0_2 = arith.constant 0 : index
    %1 = vector.load %arg2[%c0_1, %c0_2] : memref<256x64xf32, #tpu.memory_space<vmem>>, vector<256x64xf32>
    %cst = arith.constant dense<0.000000e+00> : vector<16x64xf32>
    %2 = tpu.matmul %0, %1, %cst {dimension_numbers = #tpu.dot_dimension_numbers<[1], [0], [0], [1], [0, 0, 1, 1], [], []>} : vector<16x256xf32>, vector<256x64xf32>, vector<16x64xf32> -> vector<16x64xf32>
    %c0_3 = arith.constant 0 : index
    %c0_4 = arith.constant 0 : index
    %3 = vector.load %arg3[%c0_3, %c0_4] : memref<1x64xf32, #tpu.memory_space<vmem>>, vector<1x64xf32>
    %4 = vector.broadcast %3 : vector<1x64xf32> to vector<16x64xf32>
    %5 = arith.addf %2, %4 : vector<16x64xf32>
    %c0_5 = arith.constant 0 : index
    %c0_6 = arith.constant 0 : index
    %6 = vector.load %arg4[%c0_5, %c0_6] : memref<1x64xf32, #tpu.memory_space<vmem>>, vector<1x64xf32>
    %c0_7 = arith.constant 0 : index
    %c0_8 = arith.constant 0 : index
    %7 = vector.load %arg5[%c0_7, %c0_8] : memref<1x64xf32, #tpu.memory_space<vmem>>, vector<1x64xf32>
    %cst_9 = arith.constant dense<0.000000e+00> : vector<16xf32>
    %8 = vector.multi_reduction <add>, %5, %cst_9 [1] : vector<16x64xf32> to vector<16xf32>
    %9 = vector.shape_cast %8 : vector<16xf32> to vector<16x1xf32>
    %cst_10 = arith.constant 6.400000e+01 : f32
    %10 = vector.broadcast %cst_10 : f32 to vector<16x1xf32>
    %11 = arith.divf %9, %10 : vector<16x1xf32>
    %12 = vector.broadcast %11 : vector<16x1xf32> to vector<16x64xf32>
    %13 = arith.subf %5, %12 : vector<16x64xf32>
    %14 = arith.mulf %13, %13 : vector<16x64xf32>
    %cst_11 = arith.constant dense<0.000000e+00> : vector<16xf32>
    %15 = vector.multi_reduction <add>, %14, %cst_11 [1] : vector<16x64xf32> to vector<16xf32>
    %16 = vector.shape_cast %15 : vector<16xf32> to vector<16x1xf32>
    %cst_12 = arith.constant 6.400000e+01 : f32
    %17 = vector.broadcast %cst_12 : f32 to vector<16x1xf32>
    %18 = arith.divf %16, %17 : vector<16x1xf32>
    %19 = vector.broadcast %11 : vector<16x1xf32> to vector<16x64xf32>
    %20 = arith.subf %5, %19 : vector<16x64xf32>
    %cst_13 = arith.constant 9.99999974E-6 : f32
    %21 = vector.broadcast %cst_13 : f32 to vector<16x1xf32>
    %22 = arith.addf %18, %21 : vector<16x1xf32>
    %23 = math.rsqrt %22 : vector<16x1xf32>
    %24 = vector.broadcast %23 : vector<16x1xf32> to vector<16x64xf32>
    %25 = arith.mulf %20, %24 : vector<16x64xf32>
    %26 = vector.broadcast %6 : vector<1x64xf32> to vector<16x64xf32>
    %27 = arith.mulf %25, %26 : vector<16x64xf32>
    %28 = vector.broadcast %7 : vector<1x64xf32> to vector<16x64xf32>
    %29 = arith.addf %27, %28 : vector<16x64xf32>
    %cst_14 = arith.constant 5.000000e-01 : f32
    %30 = vector.broadcast %cst_14 : f32 to vector<16x64xf32>
    %31 = arith.mulf %30, %29 : vector<16x64xf32>
    %cst_15 = arith.constant 0.707106769 : f32
    %32 = vector.broadcast %cst_15 : f32 to vector<16x64xf32>
    %33 = arith.mulf %29, %32 : vector<16x64xf32>
    %34 = math.erf %33 : vector<16x64xf32>
    %cst_16 = arith.constant 1.000000e+00 : f32
    %35 = vector.broadcast %cst_16 : f32 to vector<16x64xf32>
    %36 = arith.addf %35, %34 : vector<16x64xf32>
    %37 = arith.mulf %31, %36 : vector<16x64xf32>
    %c0_17 = arith.constant 0 : index
    %c0_18 = arith.constant 0 : index
    %38 = vector.load %arg6[%c0_17, %c0_18] : memref<64x16xf32, #tpu.memory_space<vmem>>, vector<64x16xf32>
    %cst_19 = arith.constant dense<0.000000e+00> : vector<16x16xf32>
    %39 = tpu.matmul %37, %38, %cst_19 {dimension_numbers = #tpu.dot_dimension_numbers<[1], [0], [0], [1], [0, 0, 1, 1], [], []>} : vector<16x64xf32>, vector<64x16xf32>, vector<16x16xf32> -> vector<16x16xf32>
    %c0_20 = arith.constant 0 : index
    %c0_21 = arith.constant 0 : index
    %40 = vector.load %arg7[%c0_20, %c0_21] : memref<1x16xf32, #tpu.memory_space<vmem>>, vector<1x16xf32>
    %41 = vector.broadcast %40 : vector<1x16xf32> to vector<16x16xf32>
    %42 = arith.addf %39, %41 : vector<16x16xf32>
    %c0_22 = arith.constant 0 : index
    %c0_23 = arith.constant 0 : index
    %43 = vector.load %arg8[%c0_22, %c0_23] : memref<1x16xf32, #tpu.memory_space<vmem>>, vector<1x16xf32>
    %c0_24 = arith.constant 0 : index
    %c0_25 = arith.constant 0 : index
    %44 = vector.load %arg9[%c0_24, %c0_25] : memref<1x16xf32, #tpu.memory_space<vmem>>, vector<1x16xf32>
    %cst_26 = arith.constant dense<0.000000e+00> : vector<16xf32>
    %45 = vector.multi_reduction <add>, %42, %cst_26 [1] : vector<16x16xf32> to vector<16xf32>
    %46 = vector.shape_cast %45 : vector<16xf32> to vector<16x1xf32>
    %cst_27 = arith.constant 1.600000e+01 : f32
    %47 = vector.broadcast %cst_27 : f32 to vector<16x1xf32>
    %48 = arith.divf %46, %47 : vector<16x1xf32>
    %49 = vector.broadcast %48 : vector<16x1xf32> to vector<16x16xf32>
    %50 = arith.subf %42, %49 : vector<16x16xf32>
    %51 = arith.mulf %50, %50 : vector<16x16xf32>
    %cst_28 = arith.constant dense<0.000000e+00> : vector<16xf32>
    %52 = vector.multi_reduction <add>, %51, %cst_28 [1] : vector<16x16xf32> to vector<16xf32>
    %53 = vector.shape_cast %52 : vector<16xf32> to vector<16x1xf32>
    %cst_29 = arith.constant 1.600000e+01 : f32
    %54 = vector.broadcast %cst_29 : f32 to vector<16x1xf32>
    %55 = arith.divf %53, %54 : vector<16x1xf32>
    %56 = vector.broadcast %48 : vector<16x1xf32> to vector<16x16xf32>
    %57 = arith.subf %42, %56 : vector<16x16xf32>
    %cst_30 = arith.constant 9.99999974E-6 : f32
    %58 = vector.broadcast %cst_30 : f32 to vector<16x1xf32>
    %59 = arith.addf %55, %58 : vector<16x1xf32>
    %60 = math.rsqrt %59 : vector<16x1xf32>
    %61 = vector.broadcast %60 : vector<16x1xf32> to vector<16x16xf32>
    %62 = arith.mulf %57, %61 : vector<16x16xf32>
    %63 = vector.broadcast %43 : vector<1x16xf32> to vector<16x16xf32>
    %64 = arith.mulf %62, %63 : vector<16x16xf32>
    %65 = vector.broadcast %44 : vector<1x16xf32> to vector<16x16xf32>
    %66 = arith.addf %64, %65 : vector<16x16xf32>
    %cst_31 = arith.constant 5.000000e-01 : f32
    %67 = vector.broadcast %cst_31 : f32 to vector<16x16xf32>
    %68 = arith.mulf %67, %66 : vector<16x16xf32>
    %cst_32 = arith.constant 0.707106769 : f32
    %69 = vector.broadcast %cst_32 : f32 to vector<16x16xf32>
    %70 = arith.mulf %66, %69 : vector<16x16xf32>
    %71 = math.erf %70 : vector<16x16xf32>
    %cst_33 = arith.constant 1.000000e+00 : f32
    %72 = vector.broadcast %cst_33 : f32 to vector<16x16xf32>
    %73 = arith.addf %72, %71 : vector<16x16xf32>
    %74 = arith.mulf %68, %73 : vector<16x16xf32>
    %c0_34 = arith.constant 0 : index
    %c0_35 = arith.constant 0 : index
    %75 = vector.load %arg10[%c0_34, %c0_35] : memref<16x128xf32, #tpu.memory_space<vmem>>, vector<16x128xf32>
    %cst_36 = arith.constant dense<0.000000e+00> : vector<16x128xf32>
    %76 = tpu.matmul %74, %75, %cst_36 {dimension_numbers = #tpu.dot_dimension_numbers<[1], [0], [0], [1], [0, 0, 1, 1], [], []>} : vector<16x16xf32>, vector<16x128xf32>, vector<16x128xf32> -> vector<16x128xf32>
    %c0_37 = arith.constant 0 : index
    %c0_38 = arith.constant 0 : index
    %77 = vector.load %arg11[%c0_37, %c0_38] : memref<1x128xf32, #tpu.memory_space<vmem>>, vector<1x128xf32>
    %78 = vector.broadcast %77 : vector<1x128xf32> to vector<16x128xf32>
    %79 = arith.addf %76, %78 : vector<16x128xf32>
    %c0_39 = arith.constant 0 : index
    %c0_40 = arith.constant 0 : index
    %80 = vector.load %arg12[%c0_39, %c0_40] : memref<16x128xf32, #tpu.memory_space<vmem>>, vector<16x128xf32>
    tpu.vector_store %arg12[%c0_39, %c0_40], %79 {strides = array<i32>} : memref<16x128xf32, #tpu.memory_space<vmem>>, vector<16x128xf32>,
    return
  }
  func.func @transform_0(%arg0: i32) -> (i32, i32) {
    %c0_i32 = arith.constant 0 : i32
    %c0_i32_0 = arith.constant 0 : i32
    return %arg0, %c0_i32 : i32, i32
  }
  func.func @transform_1(%arg0: i32) -> (i32, i32) {
    %c0_i32 = arith.constant 0 : i32
    %c0_i32_0 = arith.constant 0 : i32
    %c0_i32_1 = arith.constant 0 : i32
    return %c0_i32, %c0_i32_0 : i32, i32
  }
  func.func @transform_2(%arg0: i32) -> (i32, i32) {
    %c0_i32 = arith.constant 0 : i32
    %c0_i32_0 = arith.constant 0 : i32
    %c0_i32_1 = arith.constant 0 : i32
    return %c0_i32, %c0_i32_0 : i32, i32
  }
  func.func @transform_3(%arg0: i32) -> (i32, i32) {
    %c0_i32 = arith.constant 0 : i32
    %c0_i32_0 = arith.constant 0 : i32
    %c0_i32_1 = arith.constant 0 : i32
    return %c0_i32, %c0_i32_0 : i32, i32
  }
  func.func @transform_4(%arg0: i32) -> (i32, i32) {
    %c0_i32 = arith.constant 0 : i32
    %c0_i32_0 = arith.constant 0 : i32
    %c0_i32_1 = arith.constant 0 : i32
    return %c0_i32, %c0_i32_0 : i32, i32
  }
  func.func @transform_5(%arg0: i32) -> (i32, i32) {
    %c0_i32 = arith.constant 0 : i32
    %c0_i32_0 = arith.constant 0 : i32
    %c0_i32_1 = arith.constant 0 : i32
    return %c0_i32, %c0_i32_0 : i32, i32
  }
  func.func @transform_6(%arg0: i32) -> (i32, i32) {
    %c0_i32 = arith.constant 0 : i32
    %c0_i32_0 = arith.constant 0 : i32
    %c0_i32_1 = arith.constant 0 : i32
    return %c0_i32, %c0_i32_0 : i32, i32
  }
  func.func @transform_7(%arg0: i32) -> (i32, i32) {
    %c0_i32 = arith.constant 0 : i32
    %c0_i32_0 = arith.constant 0 : i32
    %c0_i32_1 = arith.constant 0 : i32
    return %c0_i32, %c0_i32_0 : i32, i32
  }
  func.func @transform_8(%arg0: i32) -> (i32, i32) {
    %c0_i32 = arith.constant 0 : i32
    %c0_i32_0 = arith.constant 0 : i32
    %c0_i32_1 = arith.constant 0 : i32
    return %c0_i32, %c0_i32_0 : i32, i32
  }
  func.func @transform_9(%arg0: i32) -> (i32, i32) {
    %c0_i32 = arith.constant 0 : i32
    %c0_i32_0 = arith.constant 0 : i32
    %c0_i32_1 = arith.constant 0 : i32
    return %c0_i32, %c0_i32_0 : i32, i32
  }
  func.func @transform_10(%arg0: i32) -> (i32, i32) {
    %c0_i32 = arith.constant 0 : i32
    %c0_i32_0 = arith.constant 0 : i32
    %c0_i32_1 = arith.constant 0 : i32
    return %c0_i32, %c0_i32_0 : i32, i32
  }
  func.func @transform_11(%arg0: i32) -> (i32, i32) {
    %c0_i32 = arith.constant 0 : i32
    %c0_i32_0 = arith.constant 0 : i32
    return %arg0, %c0_i32 : i32, i32
  }
}

</mosaic_0001>

<bundles_post_ra>
// kernel: tpu_custom_call.1
= control target key start
LH: loop header
LB: loop body
LE: loop exit
PB: predicated region body
PF: predicated region fallthrough
CT: control target
= control target key end

     0   :  { %s861_s0 = inlined_call_operand.vmem [shape: f32[16,256], index: 0, kind: input, shape index: {}]   ;;  %s862_s1 = inlined_call_operand.vmem [shape: f32[256,64], index: 1, kind: input, shape index: {}]   ;;  %s863_s2 = inlined_call_operand.vmem [shape: f32[1,64], index: 2, kind: input, shape index: {}]   ;;  %s864_s3 = inlined_call_operand.vmem [shape: f32[1,64], index: 3, kind: input, shape index: {}]   ;;  %s865_s4 = inlined_call_operand.vmem [shape: f32[1,64], index: 4, kind: input, shape index: {}]   ;;  %s866_s5 = inlined_call_operand.vmem [shape: f32[64,16], index: 5, kind: input, shape index: {}]   ;;  %s867_s6 = inlined_call_operand.vmem [shape: f32[1,16], index: 6, kind: input, shape index: {}]   ;;  %s868_s7 = inlined_call_operand.vmem [shape: f32[1,16], index: 7, kind: input, shape index: {}]   ;;  %s869_s8 = inlined_call_operand.vmem [shape: f32[1,16], index: 8, kind: input, shape index: {}]   ;;  %s870_s9 = inlined_call_operand.vmem [shape: f32[16,128], index: 9, kind: input, shape index: {}]   ;;  %s871_s10 = inlined_call_operand.vmem [shape: f32[1,128], index: 10, kind: input, shape index: {}]   ;;  %s872_s11 = inlined_call_operand.hbm [shape: f32[16,128], index: 11, kind: output, shape index: {}]  }
   0x1   :  { %v58_v0 = vld [vmem:[%s862_s1 + $0x78] sm:$0xff]  ;;  %v57_v1 = vld [vmem:[%s862_s1 + $0x70] sm:$0xff]  ;;  %v56_v4 = vld [vmem:[%s862_s1 + $0x68] sm:$0xff] }
   0x2   :  { %v74_v2 = vld [vmem:[%s862_s1 + $0xf8] sm:$0xff]  ;;  %79 = vmatpush.msra.mxu0 %v58_v0  ;;  %v73_v3 = vld [vmem:[%s862_s1 + $0xf0] sm:$0xff]  ;;  %v72_v5 = vld [vmem:[%s862_s1 + $0xe8] sm:$0xff] }
   0x3   :  { %102 = vmatpush.msra.mxu1 %v74_v2  ;;  %v55_v6 = vld [vmem:[%s862_s1 + $0x60] sm:$0xff]  ;;  %v54_v8 = vld [vmem:[%s862_s1 + $0x58] sm:$0xff]  ;;  %v53_v10 = vld [vmem:[%s862_s1 + $0x50] sm:$0xff] }
   0x4   :  { %80 = vmatpush.msra.mxu0 %v57_v1  ;;  %v71_v7 = vld [vmem:[%s862_s1 + $0xe0] sm:$0xff]  ;;  %v70_v9 = vld [vmem:[%s862_s1 + $0xd8] sm:$0xff]  ;;  %v69_v11 = vld [vmem:[%s862_s1 + $0xd0] sm:$0xff] }
   0x5   :  { %103 = vmatpush.msra.mxu1 %v73_v3  ;;  %v52_v12 = vld [vmem:[%s862_s1 + $0x48] sm:$0xff]  ;;  %v51_v14 = vld [vmem:[%s862_s1 + $0x40] sm:$0xff]  ;;  %v50_v16 = vld [vmem:[%s862_s1 + $0x38] sm:$0xff] }
   0x6   :  { %81 = vmatpush.msra.mxu0 %v56_v4  ;;  %v68_v13 = vld [vmem:[%s862_s1 + $0xc8] sm:$0xff]  ;;  %v67_v15 = vld [vmem:[%s862_s1 + $0xc0] sm:$0xff]  ;;  %v66_v17 = vld [vmem:[%s862_s1 + $0xb8] sm:$0xff] }
   0x7   :  { %104 = vmatpush.msra.mxu1 %v72_v5 }
   0x8   :  { %82 = vmatpush.msra.mxu0 %v55_v6 }
   0x9   :  { %105 = vmatpush.msra.mxu1 %v71_v7 }
   0xa   :  { %83 = vmatpush.msra.mxu0 %v54_v8 }
   0xb   :  { %106 = vmatpush.msra.mxu1 %v70_v9 }
   0xc   :  { %84 = vmatpush.msra.mxu0 %v53_v10 }
   0xd   :  { %107 = vmatpush.msra.mxu1 %v69_v11 }
   0xe   :  { %85 = vmatpush.msra.mxu0 %v52_v12 }
   0xf   :  { %108 = vmatpush.msra.mxu1 %v68_v13 }
  0x10   :  { %16 = vsyncpa [#allocation3], 0  ;;  %86 = vmatpush.msra.mxu0 %v51_v14  ;;  %v49_v18 = vld [vmem:[%s862_s1 + $0x30] sm:$0xff]  ;;  %v48_v20 = vld [vmem:[%s862_s1 + $0x28] sm:$0xff]  ;;  %vm127_vm0 = vcmask 523264   ;;  %v591_v47 = vmov 64.0  }
  0x11   :  { %109 = vmatpush.msra.mxu1 %v67_v15  ;;  %v65_v19 = vld [vmem:[%s862_s1 + $0xb0] sm:$0xff]  ;;  %v64_v21 = vld [vmem:[%s862_s1 + $0xa8] sm:$0xff]  ;;  %v47_v22 = vld [vmem:[%s862_s1 + $0x20] sm:$0xff]  ;;  %545 = vrcp.f32 %v591_v47  ;;  %s593_s15 = smov [#allocation2]   ;;  %s513_s19 = sshll.u32 %s872_s11, 4  ;;  %s514_s19 = int_to_ptr.hbm [resolvable:$true] %s513_s19 }
  0x12   :  { %87 = vmatpush.msra.mxu0 %v50_v16  ;;  %v63_v23 = vld [vmem:[%s862_s1 + $0xa0] sm:$0xff]  ;;  %v46_v24 = vld [vmem:[%s862_s1 + $0x18] sm:$0xff]  ;;  %v45_v26 = vld [vmem:[%s862_s1 + $0x10] sm:$0xff]  ;;  %s511_s16 = sshll.u32 %s593_s15, 4  ;;  %s594_s20 = smov 128   ;;  %s512_s16 = int_to_ptr.vmem [resolvable:$true] %s511_s16 }
  0x13   :  { %110 = vmatpush.msra.mxu1 %v66_v17  ;;  %v62_v25 = vld [vmem:[%s862_s1 + $0x98] sm:$0xff]  ;;  %v61_v27 = vld [vmem:[%s862_s1 + $0x90] sm:$0xff]  ;;  %v44_v28 = vld [vmem:[%s862_s1 + $0x8] sm:$0xff]  ;;  %s595_s21 = smov 8  }
  0x14   :  { %88 = vmatpush.msra.mxu0 %v49_v18  ;;  %v60_v29 = vld [vmem:[%s862_s1 + $0x88] sm:$0xff]  ;;  %v43_v30 = vld [vmem:[%s862_s1] sm:$0xff]  ;;  %v41_v34 = vld [vmem:[%s861_s0 + $0x10] sm:$0xff] }
  0x15   :  { %111 = vmatpush.msra.mxu1 %v65_v19  ;;  %v59_v31 = vld [vmem:[%s862_s1 + $0x80] sm:$0xff]  ;;  %v40_v33 = vld [vmem:[%s861_s0 + $0x8] sm:$0xff]  ;;  %v42_v35 = vld [vmem:[%s861_s0 + $0x18] sm:$0xff] }
  0x16   :  { %89 = vmatpush.msra.mxu0 %v48_v20  ;;  %v39_v32 = vld [vmem:[%s861_s0] sm:$0xff]  ;;  %v284_v0 = vld [vmem:[%s866_s5 + $0x38] sm:$0xff]  ;;  %v283_v1 = vld [vmem:[%s866_s5 + $0x30] sm:$0xff] }
  0x17   :  { %112 = vmatpush.msra.mxu1 %v64_v21  ;;  %v538_v36 = vld [vmem:[%s863_s2] ss:$0 sm:$0xff]  ;;  %v546_v48 = vpop.eup %545  ;;  %303 = vmatpush.msra.mxu2 %v284_v0  ;;  %v282_v4 = vld [vmem:[%s866_s5 + $0x28] sm:$0xff]  ;;  %v280_v7 = vld [vmem:[%s866_s5 + $0x18] sm:$0xff] }
  0x18   :  { %90 = vmatpush.msra.mxu0 %v47_v22  ;;  %v135_v49 = vmul.f32 64.0, %v546_v48  ;;  %vm139_vm1 = vweird.f32 %v546_v48  ;;  %v281_v6 = vld [vmem:[%s866_s5 + $0x20] sm:$0xff]  ;;  %v279_v8 = vld [vmem:[%s866_s5 + $0x10] sm:$0xff]  ;;  %v278_v11 = vld [vmem:[%s866_s5 + $0x8] sm:$0xff] }
  0x19   :  { %113 = vmatpush.msra.mxu1 %v63_v23  ;;  %304 = vmatpush.msra.mxu2 %v283_v1  ;;  %v277_v14 = vld [vmem:[%s866_s5] sm:$0xff] }
  0x1a   :  { %91 = vmatpush.msra.mxu0 %v46_v24  ;;  %v136_v50 = vsub.f32 1.0, %v135_v49  ;;  %v539_v22 = vld [vmem:[%s864_s3] ss:$0 sm:$0xff] }
  0x1b   :  { %114 = vmatpush.msra.mxu1 %v62_v25  ;;  %305 = vmatpush.msra.mxu2 %v282_v4 }
  0x1c   :  { %92 = vmatpush.msra.mxu0 %v45_v26  ;;  %v137_v51 = vmul.f32 %v546_v48, %v136_v50  ;;  %v540_v26 = vld [vmem:[%s865_s4] ss:$0 sm:$0xff] }
  0x1d   :  { %115 = vmatpush.msra.mxu1 %v61_v27  ;;  %306 = vmatpush.msra.mxu2 %v281_v6 }
  0x1e   :  { %93 = vmatpush.msra.mxu0 %v44_v28  ;;  %v138_v52 = vadd.f32 %v546_v48, %v137_v51 }
  0x1f   :  { %116 = vmatpush.msra.mxu1 %v60_v29  ;;  %307 = vmatpush.msra.mxu2 %v280_v7 }
  0x20   :  { %94 = vmatpush.msra.mxu0 %v43_v30  ;;  %v140_v53 = vsel %vm139_vm1, %v546_v48, %v138_v52  ;;  %vm320_vm1 = vcmask 130048  }
  0x21   :  { %117 = vmatpush.msra.mxu1 %v59_v31  ;;  %95 = vmatmul.f32.vlgmr.msra.gmra.mxu0 %v39_v32 }
  0x22   :  { %118 = vmatmul.f32.vlgmr.msra.gmra.mxu1 %v40_v33  ;;  %308 = vmatpush.msra.mxu2 %v279_v8 }
  0x24   :  { %309 = vmatpush.msra.mxu2 %v278_v11 }
  0x26   :  { %310 = vmatpush.msra.mxu2 %v277_v14 }
  0x29   :  { %98 = vmatmul.f32.gmra.mxu0 %v41_v34 }
  0x2a   :  { %121 = vmatmul.f32.gmra.mxu1 %v42_v35 }
  0x9e   :  { %v96_v37 = vpop.f32.mrf.mxu0 }
  0x9f   :  { %v119_v38 = vpop.f32.mrf.mxu1  ;;  %v97_v39 = vadd.f32 %v538_v36, %v96_v37 }
  0xa1   :  { %v120_v40 = vadd.f32 %v119_v38, %v97_v39 }
  0xa3   :  { %v128_v41 = vsel %vm127_vm0, %v120_v40, 0.0 }
  0xa4   :  { %129 = vadd.xlane.f32.xlu0 %v128_v41 }
  0xa6   :  { %v99_v42 = vpop.f32.mrf.mxu0 }
  0xa7   :  { %v122_v43 = vpop.f32.mrf.mxu1  ;;  %v100_v44 = vadd.f32 %v538_v36, %v99_v42 }
  0xa9   :  { %v123_v45 = vadd.f32 %v122_v43, %v100_v44 }
  0xab   :  { %v131_v46 = vsel %vm127_vm0, %v123_v45, 0.0 }
  0xac   :  { %132 = vadd.xlane.f32.xlu0 %v131_v46 }
 0x117   :  { %v130_v54 = vpop.xlane.xlu0 %129 }
 0x118   :  { %v141_v55 = vmul.f32 %v140_v53, %v130_v54 }
 0x11a   :  { %v143_v56 = vsub.f32 %v120_v40, %v141_v55 }
 0x11c   :  { %v145_v57 = vmul.f32 %v143_v56, %v143_v56 }
 0x11e   :  { %v147_v58 = vsel %vm127_vm0, %v145_v57, 0.0 }
 0x11f   :  { %148 = vadd.xlane.f32.xlu1 %v147_v58  ;;  %v133_v59 = vpop.xlane.xlu0 %132 }
 0x120   :  { %v142_v60 = vmul.f32 %v140_v53, %v133_v59 }
 0x122   :  { %v144_v61 = vsub.f32 %v123_v45, %v142_v60 }
 0x124   :  { %v146_v62 = vmul.f32 %v144_v61, %v144_v61 }
 0x126   :  { %v150_v63 = vsel %vm127_vm0, %v146_v62, 0.0 }
 0x127   :  { %151 = vadd.xlane.f32.xlu1 %v150_v63 }
 0x192   :  { %v149_v2 = vpop.xlane.xlu1 %148 }
 0x193   :  { %v153_v3 = vmul.f32 %v149_v2, %v140_v53 }
 0x195   :  { %v155_v5 = vadd.f32 1e-05, %v153_v3 }
 0x197   :  { %547 = vrsqrt.f32 %v155_v5  ;;  %vm163_vm3 = vweird.f32 %v155_v5 }
 0x19a   :  { %v152_v9 = vpop.xlane.xlu1 %151 }
 0x19b   :  { %v154_v10 = vmul.f32 %v152_v9, %v140_v53 }
 0x19d   :  { %v548_v12 = vpop.eup %547  ;;  %v156_v13 = vadd.f32 1e-05, %v154_v10 }
 0x19e   :  { %v158_v15 = vmul.f32 %v548_v12, %v155_v5  ;;  %vm164_vm2 = vweird.f32 %v548_v12 }
 0x19f   :  { %549 = vrsqrt.f32 %v156_v13  ;;  %vm165_vm4 = vmor %vm163_vm3, %vm164_vm2  ;;  %vm173_vm6 = vweird.f32 %v156_v13 }
 0x1a0   :  { %v159_v16 = vmul.f32 %v548_v12, %v158_v15 }
 0x1a2   :  { %v160_v17 = vmul.f32 0.5, %v159_v16 }
 0x1a4   :  { %v161_v18 = vsub.f32 1.5, %v160_v17 }
 0x1a5   :  { %v550_v19 = vpop.eup %549 }
 0x1a6   :  { %v162_v20 = vmul.f32 %v548_v12, %v161_v18  ;;  %v168_v21 = vmul.f32 %v550_v19, %v156_v13  ;;  %vm174_vm5 = vweird.f32 %v550_v19 }
 0x1a7   :  { %vm175_vm7 = vmor %vm173_vm6, %vm174_vm5 }
 0x1a8   :  { %v166_v23 = vsel %vm165_vm4, %v548_v12, %v162_v20  ;;  %v169_v24 = vmul.f32 %v550_v19, %v168_v21 }
 0x1a9   :  { %v177_v25 = vmul.f32 %v166_v23, %v143_v56 }
 0x1aa   :  { %v170_v27 = vmul.f32 0.5, %v169_v24 }
 0x1ab   :  { %v182_v28 = vmul.f32 %v539_v22, %v177_v25 }
 0x1ac   :  { %v171_v29 = vsub.f32 1.5, %v170_v27 }
 0x1ad   :  { %v801_v30 = vadd.f32 %v540_v26, %v182_v28 }
 0x1ae   :  { %v172_v31 = vmul.f32 %v550_v19, %v171_v29 }
 0x1af   :  { %v191_v32 = vmul.f32 0.70710677, %v801_v30 }
 0x1b0   :  { %v176_v33 = vsel %vm175_vm7, %v550_v19, %v172_v31 }
 0x1b1   :  { %v178_v34 = vmul.f32 %v176_v33, %v144_v61  ;;  %v193_v35 = vmul.f32 %v191_v32, %v191_v32 }
 0x1b3   :  { %v194_v36 = vmin.f32 %v193_v35, 16.0  ;;  %v183_v37 = vmul.f32 %v539_v22, %v178_v34 }
 0x1b5   :  { %v195_v38 = vmul.f32 2.1237322e-06, %v194_v36  ;;  %v206_v39 = vmul.f32 3.8918573e-05, %v194_v36  ;;  %v804_v40 = vadd.f32 %v540_v26, %v183_v37 }
 0x1b7   :  { %v196_v41 = vadd.f32 0.00028619796, %v195_v38  ;;  %v207_v42 = vadd.f32 0.001143296, %v206_v39  ;;  %v807_v43 = vmul.f32 0.70710677, %v804_v40 }
 0x1b8   :  { %v189_v39 = vmul.f32 0.5, %v801_v30  ;;  %v541_v30 = vld [vmem:[%s867_s6] ss:$0 sm:$0xff] }
 0x1b9   :  { %v197_v44 = vmul.f32 %v196_v41, %v194_v36  ;;  %v208_v45 = vmul.f32 %v207_v42, %v194_v36  ;;  %v233_v46 = vmul.f32 %v807_v43, %v807_v43 }
 0x1bb   :  { %v209_v47 = vadd.f32 0.014752088, %v208_v45  ;;  %v198_v48 = vadd.f32 0.0036580483, %v197_v44  ;;  %v234_v49 = vmin.f32 %v233_v46, 16.0 }
 0x1bd   :  { %v210_v50 = vmul.f32 %v209_v47, %v194_v36  ;;  %v235_v51 = vmul.f32 2.1237322e-06, %v234_v49  ;;  %v246_v52 = vmul.f32 3.8918573e-05, %v234_v49  ;;  %v199_v54 = vmul.f32 %v198_v48, %v194_v36 }
 0x1bf   :  { %v211_v53 = vadd.f32 0.112945676, %v210_v50  ;;  %v236_v55 = vadd.f32 0.00028619796, %v235_v51  ;;  %v247_v56 = vadd.f32 0.001143296, %v246_v52 }
 0x1c0   :  { %v200_v61 = vadd.f32 0.05243302, %v199_v54  ;;  %v190_v50 = vmul.f32 0.5, %v804_v40  ;;  %v592_v40 = vmov 16.0  }
 0x1c1   :  { %v212_v57 = vmul.f32 %v211_v53, %v194_v36  ;;  %v237_v58 = vmul.f32 %v236_v55, %v234_v49  ;;  %v248_v59 = vmul.f32 %v247_v56, %v234_v49 }
 0x1c2   :  { %v201_v3 = vmul.f32 %v200_v61, %v194_v36 }
 0x1c3   :  { %v213_v60 = vadd.f32 0.4994258, %v212_v57  ;;  %v249_v62 = vadd.f32 0.014752088, %v248_v59  ;;  %v238_v0 = vadd.f32 0.0036580483, %v237_v58 }
 0x1c4   :  { %v202_v7 = vadd.f32 0.18741608, %v201_v3 }
 0x1c5   :  { %v214_v63 = vmul.f32 %v213_v60, %v194_v36  ;;  %v250_v1 = vmul.f32 %v249_v62, %v234_v49  ;;  %v239_v5 = vmul.f32 %v238_v0, %v234_v49 }
 0x1c6   :  { %v203_v12 = vmul.f32 %v202_v7, %v194_v36 }
 0x1c7   :  { %v215_v2 = vadd.f32 1.0, %v214_v63  ;;  %v251_v4 = vadd.f32 0.112945676, %v250_v1  ;;  %v240_v9 = vadd.f32 0.05243302, %v239_v5 }
 0x1c8   :  { %v204_v18 = vadd.f32 1.1283791, %v203_v12  ;;  %v470_v12 = vld [vmem:[%s870_s9] sm:$0xff] }
 0x1c9   :  { %551 = vrcp.f32 %v215_v2  ;;  %v252_v6 = vmul.f32 %v251_v4, %v234_v49  ;;  %v241_v15 = vmul.f32 %v240_v9, %v234_v49  ;;  %v227_v17 = vand.u32 2147483648, %v215_v2 }
 0x1ca   :  { %v225_v20 = vand.u32 2147483647, %v215_v2  ;;  %vm221_vm9 = vweird.f32 %v215_v2  ;;  %v205_v25 = vmul.f32 %v204_v18, %v191_v32 }
 0x1cb   :  { %v253_v8 = vadd.f32 0.4994258, %v252_v6  ;;  %v242_v21 = vadd.f32 0.18741608, %v241_v15  ;;  %v228_v23 = vor.u32 1.1754944e-38, %v227_v17 }
 0x1cc   :  { %vm226_vm11 = vcmp.eq.f32.partialorder %v225_v20, 8.507059e+37 }
 0x1cd   :  { %v254_v10 = vmul.f32 %v253_v8, %v234_v49  ;;  %v243_v28 = vmul.f32 %v242_v21, %v234_v49 }
 0x1cf   :  { %v552_v11 = vpop.eup %551  ;;  %v255_v14 = vadd.f32 1.0, %v254_v10  ;;  %v244_v36 = vadd.f32 1.1283791, %v243_v28 }
 0x1d0   :  { %v217_v13 = vmul.f32 %v552_v11, %v215_v2  ;;  %vm222_vm8 = vweird.f32 %v552_v11 }
 0x1d1   :  { %553 = vrcp.f32 %v255_v14  ;;  %vm223_vm10 = vmor %vm221_vm9, %vm222_vm8  ;;  %v267_v35 = vand.u32 2147483648, %v255_v14  ;;  %v265_v38 = vand.u32 2147483647, %v255_v14  ;;  %vm261_vm13 = vweird.f32 %v255_v14 }
 0x1d2   :  { %v218_v16 = vsub.f32 1.0, %v217_v13  ;;  %v245_v45 = vmul.f32 %v244_v36, %v807_v43  ;;  %555 = vrcp.f32 %v592_v40 }
 0x1d3   :  { %v268_v32 = vor.u32 1.1754944e-38, %v267_v35  ;;  %vm266_vm15 = vcmp.eq.f32.partialorder %v265_v38, 8.507059e+37 }
 0x1d4   :  { %v219_v19 = vmul.f32 %v552_v11, %v218_v16 }
 0x1d6   :  { %v220_v22 = vadd.f32 %v552_v11, %v219_v19 }
 0x1d7   :  { %v554_v24 = vpop.eup %553 }
 0x1d8   :  { %v224_v26 = vsel %vm223_vm10, %v552_v11, %v220_v22  ;;  %v257_v29 = vmul.f32 %v554_v24, %v255_v14  ;;  %vm262_vm12 = vweird.f32 %v554_v24  ;;  %v556_v58 = vpop.eup %555  ;;  %v471_v11 = vld [vmem:[%s870_s9 + $0x8] sm:$0xff] }
 0x1d9   :  { %v229_v27 = vsel %vm226_vm11, %v228_v23, %v224_v26  ;;  %vm263_vm14 = vmor %vm261_vm13, %vm262_vm12  ;;  %v328_v59 = vmul.f32 16.0, %v556_v58  ;;  %496 = vmatpush.msra.mxu3 %v471_v11  ;;  %v542_v26 = vld [vmem:[%s868_s7] ss:$0 sm:$0xff] }
 0x1da   :  { %v230_v31 = vmul.f32 %v229_v27, %v205_v25  ;;  %v258_v33 = vsub.f32 1.0, %v257_v29 }
 0x1db   :  { %v329_v60 = vsub.f32 1.0, %v328_v59  ;;  %497 = vmatpush.msra.mxu3 %v470_v12 }
 0x1dc   :  { %v525_v34 = vclamps-f32 %v230_v31, 1.0  ;;  %v259_v37 = vmul.f32 %v554_v24, %v258_v33  ;;  %v543_v31 = vld [vmem:[%s869_s8] ss:$0 sm:$0xff] }
 0x1dd   :  { %v330_v61 = vmul.f32 %v556_v58, %v329_v60 }
 0x1de   :  { %v273_v41 = vadd.f32 1.0, %v525_v34  ;;  %v260_v42 = vadd.f32 %v554_v24, %v259_v37 }
 0x1df   :  { %v331_v62 = vadd.f32 %v556_v58, %v330_v61 }
 0x1e0   :  { %v275_v44 = vmul.f32 %v273_v41, %v189_v39  ;;  %v264_v46 = vsel %vm263_vm14, %v554_v24, %v260_v42 }
 0x1e1   :  { %v269_v47 = vsel %vm266_vm15, %v268_v32, %v264_v46 }
 0x1e2   :  { %527 = vmatmul.msk.f32.vlgmr.msra.gmra.mxu2 %vm127_vm0, %v275_v44  ;;  %v270_v48 = vmul.f32 %v269_v47, %v245_v45 }
 0x1e4   :  { %v526_v49 = vclamps-f32 %v270_v48, 1.0 }
 0x1e6   :  { %v274_v51 = vadd.f32 1.0, %v526_v49 }
 0x1e8   :  { %v276_v52 = vmul.f32 %v274_v51, %v190_v50 }
 0x1ea   :  { %528 = vmatmul.msk.f32.gmra.mxu2 %vm127_vm0, %v276_v52  ;;  %vm332_vm0 = vweird.f32 %v556_v58 }
 0x1eb   :  { %v333_v63 = vsel %vm332_vm0, %v556_v58, %v331_v62 }
 0x265   :  { %v312_v53 = vpop.f32.mrf.mxu2 }
 0x266   :  { %v313_v43 = vadd.f32 %v541_v30, %v312_v53 }
 0x268   :  { %v321_v54 = vsel %vm320_vm1, %v313_v43, 0.0 }
 0x269   :  { %322 = vadd.xlane.f32.xlu2 %v321_v54 }
 0x26d   :  { %v315_v55 = vpop.f32.mrf.mxu2 }
 0x26e   :  { %v316_v56 = vadd.f32 %v541_v30, %v315_v55 }
 0x270   :  { %v324_v57 = vsel %vm320_vm1, %v316_v56, 0.0 }
 0x271   :  { %325 = vadd.xlane.f32.xlu2 %v324_v57 }
 0x2dc   :  { %v323_v0 = vpop.xlane.xlu2 %322 }
 0x2dd   :  { %v334_v1 = vmul.f32 %v333_v63, %v323_v0 }
 0x2df   :  { %v336_v2 = vsub.f32 %v313_v43, %v334_v1 }
 0x2e1   :  { %v338_v3 = vmul.f32 %v336_v2, %v336_v2 }
 0x2e3   :  { %v340_v4 = vsel %vm320_vm1, %v338_v3, 0.0 }
 0x2e4   :  { %341 = vadd.xlane.f32.xlu0 %v340_v4  ;;  %v326_v5 = vpop.xlane.xlu2 %325 }
 0x2e5   :  { %v335_v6 = vmul.f32 %v333_v63, %v326_v5 }
 0x2e7   :  { %v337_v7 = vsub.f32 %v316_v56, %v335_v6 }
 0x2e9   :  { %v339_v8 = vmul.f32 %v337_v7, %v337_v7 }
 0x2eb   :  { %v343_v9 = vsel %vm320_vm1, %v339_v8, 0.0 }
 0x2ec   :  { %344 = vadd.xlane.f32.xlu1 %v343_v9 }
 0x357   :  { %v342_v10 = vpop.xlane.xlu0 %341 }
 0x358   :  { %v346_v13 = vmul.f32 %v342_v10, %v333_v63 }
 0x35a   :  { %v348_v14 = vadd.f32 1e-05, %v346_v13 }
 0x35c   :  { %557 = vrsqrt.f32 %v348_v14  ;;  %vm356_vm3 = vweird.f32 %v348_v14 }
 0x35f   :  { %v345_v15 = vpop.xlane.xlu1 %344 }
 0x360   :  { %v347_v16 = vmul.f32 %v345_v15, %v333_v63 }
 0x362   :  { %v558_v17 = vpop.eup %557  ;;  %v349_v19 = vadd.f32 1e-05, %v347_v16 }
 0x363   :  { %v351_v18 = vmul.f32 %v558_v17, %v348_v14  ;;  %vm357_vm2 = vweird.f32 %v558_v17 }
 0x364   :  { %559 = vrsqrt.f32 %v349_v19  ;;  %vm358_vm4 = vmor %vm356_vm3, %vm357_vm2  ;;  %vm366_vm6 = vweird.f32 %v349_v19 }
 0x365   :  { %v352_v20 = vmul.f32 %v558_v17, %v351_v18 }
 0x367   :  { %v353_v21 = vmul.f32 0.5, %v352_v20 }
 0x369   :  { %v354_v22 = vsub.f32 1.5, %v353_v21 }
 0x36a   :  { %v560_v23 = vpop.eup %559 }
 0x36b   :  { %v355_v24 = vmul.f32 %v558_v17, %v354_v22  ;;  %v361_v25 = vmul.f32 %v560_v23, %v349_v19  ;;  %vm367_vm5 = vweird.f32 %v560_v23 }
 0x36c   :  { %vm368_vm7 = vmor %vm366_vm6, %vm367_vm5 }
 0x36d   :  { %v359_v27 = vsel %vm358_vm4, %v558_v17, %v355_v24  ;;  %v362_v29 = vmul.f32 %v560_v23, %v361_v25 }
 0x36e   :  { %v370_v28 = vmul.f32 %v359_v27, %v336_v2 }
 0x36f   :  { %v363_v33 = vmul.f32 0.5, %v362_v29 }
 0x370   :  { %v375_v34 = vmul.f32 %v542_v26, %v370_v28 }
 0x371   :  { %v364_v35 = vsub.f32 1.5, %v363_v33 }
 0x372   :  { %v835_v36 = vadd.f32 %v543_v31, %v375_v34 }
 0x373   :  { %v365_v37 = vmul.f32 %v560_v23, %v364_v35 }
 0x374   :  { %v838_v38 = vmul.f32 0.70710677, %v835_v36 }
 0x375   :  { %v369_v39 = vsel %vm368_vm7, %v560_v23, %v365_v37 }
 0x376   :  { %v386_v41 = vmul.f32 %v838_v38, %v838_v38  ;;  %v371_v42 = vmul.f32 %v369_v39, %v337_v7 }
 0x378   :  { %v387_v44 = vmin.f32 %v386_v41, 16.0  ;;  %v376_v32 = vmul.f32 %v542_v26, %v371_v42 }
 0x37a   :  { %v388_v45 = vmul.f32 2.1237322e-06, %v387_v44  ;;  %v399_v46 = vmul.f32 3.8918573e-05, %v387_v44  ;;  %v842_v47 = vadd.f32 %v543_v31, %v376_v32 }
 0x37c   :  { %v389_v48 = vadd.f32 0.00028619796, %v388_v45  ;;  %v400_v49 = vadd.f32 0.001143296, %v399_v46  ;;  %v845_v50 = vmul.f32 0.70710677, %v842_v47 }
 0x37d   :  { %v382_v46 = vmul.f32 0.5, %v835_v36  ;;  %v544_v36 = vld [vmem:[%s871_s10] ss:$0 sm:$0xff] }
 0x37e   :  { %v390_v51 = vmul.f32 %v389_v48, %v387_v44  ;;  %v401_v52 = vmul.f32 %v400_v49, %v387_v44  ;;  %v426_v30 = vmul.f32 %v845_v50, %v845_v50 }
 0x380   :  { %v402_v53 = vadd.f32 0.014752088, %v401_v52  ;;  %v391_v43 = vadd.f32 0.0036580483, %v390_v51  ;;  %v427_v54 = vmin.f32 %v426_v30, 16.0 }
 0x382   :  { %v403_v55 = vmul.f32 %v402_v53, %v387_v44  ;;  %v428_v56 = vmul.f32 2.1237322e-06, %v427_v54  ;;  %v439_v57 = vmul.f32 3.8918573e-05, %v427_v54  ;;  %v392_v58 = vmul.f32 %v391_v43, %v387_v44 }
 0x384   :  { %v404_v40 = vadd.f32 0.112945676, %v403_v55  ;;  %v429_v59 = vadd.f32 0.00028619796, %v428_v56  ;;  %v440_v60 = vadd.f32 0.001143296, %v439_v57 }
 0x385   :  { %v393_v1 = vadd.f32 0.05243302, %v392_v58  ;;  %v383_v55 = vmul.f32 0.5, %v842_v47 }
 0x386   :  { %v405_v61 = vmul.f32 %v404_v40, %v387_v44  ;;  %v430_v62 = vmul.f32 %v429_v59, %v427_v54  ;;  %v441_v63 = vmul.f32 %v440_v60, %v427_v54 }
 0x387   :  { %v394_v7 = vmul.f32 %v393_v1, %v387_v44 }
 0x388   :  { %v406_v0 = vadd.f32 0.4994258, %v405_v61  ;;  %v442_v2 = vadd.f32 0.014752088, %v441_v63  ;;  %v431_v4 = vadd.f32 0.0036580483, %v430_v62 }
 0x389   :  { %v395_v11 = vadd.f32 0.18741608, %v394_v7 }
 0x38a   :  { %v407_v3 = vmul.f32 %v406_v0, %v387_v44  ;;  %v443_v5 = vmul.f32 %v442_v2, %v427_v54  ;;  %v432_v9 = vmul.f32 %v431_v4, %v427_v54 }
 0x38b   :  { %v396_v16 = vmul.f32 %v395_v11, %v387_v44 }
 0x38c   :  { %v408_v6 = vadd.f32 1.0, %v407_v3  ;;  %v444_v8 = vadd.f32 0.112945676, %v443_v5  ;;  %v433_v13 = vadd.f32 0.05243302, %v432_v9 }
 0x38d   :  { %v397_v22 = vadd.f32 1.1283791, %v396_v16 }
 0x38e   :  { %561 = vrcp.f32 %v408_v6  ;;  %v445_v10 = vmul.f32 %v444_v8, %v427_v54  ;;  %v434_v19 = vmul.f32 %v433_v13, %v427_v54  ;;  %v420_v21 = vand.u32 2147483648, %v408_v6 }
 0x38f   :  { %v418_v24 = vand.u32 2147483647, %v408_v6  ;;  %vm414_vm9 = vweird.f32 %v408_v6  ;;  %v398_v29 = vmul.f32 %v397_v22, %v838_v38 }
 0x390   :  { %v446_v12 = vadd.f32 0.4994258, %v445_v10  ;;  %v435_v25 = vadd.f32 0.18741608, %v434_v19  ;;  %v421_v27 = vor.u32 1.1754944e-38, %v420_v21 }
 0x391   :  { %vm419_vm11 = vcmp.eq.f32.partialorder %v418_v24, 8.507059e+37 }
 0x392   :  { %v447_v14 = vmul.f32 %v446_v12, %v427_v54  ;;  %v436_v34 = vmul.f32 %v435_v25, %v427_v54 }
 0x394   :  { %v562_v15 = vpop.eup %561  ;;  %v448_v18 = vadd.f32 1.0, %v447_v14  ;;  %v437_v44 = vadd.f32 1.1283791, %v436_v34 }
 0x395   :  { %v410_v17 = vmul.f32 %v562_v15, %v408_v6  ;;  %vm415_vm8 = vweird.f32 %v562_v15 }
 0x396   :  { %563 = vrcp.f32 %v448_v18  ;;  %vm416_vm10 = vmor %vm414_vm9, %vm415_vm8  ;;  %v460_v42 = vand.u32 2147483648, %v448_v18  ;;  %v458_v45 = vand.u32 2147483647, %v448_v18  ;;  %vm454_vm13 = vweird.f32 %v448_v18 }
 0x397   :  { %v411_v20 = vsub.f32 1.0, %v410_v17  ;;  %v438_v52 = vmul.f32 %v437_v44, %v845_v50 }
 0x398   :  { %v461_v38 = vor.u32 1.1754944e-38, %v460_v42  ;;  %vm459_vm15 = vcmp.eq.f32.partialorder %v458_v45, 8.507059e+37 }
 0x399   :  { %v412_v23 = vmul.f32 %v562_v15, %v411_v20 }
 0x39b   :  { %v413_v26 = vadd.f32 %v562_v15, %v412_v23 }
 0x39c   :  { %v564_v28 = vpop.eup %563 }
 0x39d   :  { %v417_v31 = vsel %vm416_vm10, %v562_v15, %v413_v26  ;;  %v450_v35 = vmul.f32 %v564_v28, %v448_v18  ;;  %vm455_vm12 = vweird.f32 %v564_v28 }
 0x39e   :  { %v422_v33 = vsel %vm419_vm11, %v421_v27, %v417_v31  ;;  %vm456_vm14 = vmor %vm454_vm13, %vm455_vm12 }
 0x39f   :  { %v423_v37 = vmul.f32 %v422_v33, %v398_v29  ;;  %v451_v39 = vsub.f32 1.0, %v450_v35 }
 0x3a1   :  { %v529_v41 = vclamps-f32 %v423_v37, 1.0  ;;  %v452_v32 = vmul.f32 %v564_v28, %v451_v39 }
 0x3a3   :  { %v466_v48 = vadd.f32 1.0, %v529_v41  ;;  %v453_v49 = vadd.f32 %v564_v28, %v452_v32 }
 0x3a5   :  { %v468_v51 = vmul.f32 %v466_v48, %v382_v46  ;;  %v457_v30 = vsel %vm456_vm14, %v564_v28, %v453_v49 }
 0x3a6   :  { %v462_v53 = vsel %vm459_vm15, %v461_v38, %v457_v30 }
 0x3a7   :  { %531 = vmatmul.msk.f32.vlgmr.msra.gmra.mxu3 %vm320_vm1, %v468_v51  ;;  %v463_v43 = vmul.f32 %v462_v53, %v438_v52 }
 0x3a9   :  { %v530_v54 = vclamps-f32 %v463_v43, 1.0 }
 0x3ab   :  { %v467_v56 = vadd.f32 1.0, %v530_v54 }
 0x3ad   :  { %v469_v57 = vmul.f32 %v467_v56, %v383_v55 }
 0x3af   :  { %532 = vmatmul.msk.f32.gmra.mxu3 %vm320_vm1, %v469_v57 }
 0x42a   :  { %v499_v40 = vpop.f32.mrf.mxu3 }
 0x42b   :  { %v500_v58 = vadd.f32 %v544_v36, %v499_v40 }
 0x42d   :  { %505 = vst [vmem:[#allocation2] sm:$0xff] %v500_v58 }
 0x432   :  { %v502_v50 = vpop.f32.mrf.mxu3 }
 0x433   :  { %v503_v47 = vadd.f32 %v544_v36, %v502_v50 }
 0x435   :  { %506 = vst [vmem:[#allocation2 + $0x8] sm:$0xff] %v503_v47 }
 0x436   :  { %519 = dma.vmem_to_hbm [thread:$0]  %s512_s16, 256, %s514_s19, [#allocation3], %s594_s20, %s594_s20, %s595_s21  }
 0x437   :  { %589 = dma.done.wait [#allocation3], 256  }
 0x438   :  { %590 = vsyncadd [#allocation3], 4294967040 }
 0x439   :  { %524 = vsyncpa [#allocation3], 1 }

// kernel: tpu_custom_call.1
= control target key start
LH: loop header
LB: loop body
LE: loop exit
PB: predicated region body
PF: predicated region fallthrough
CT: control target
= control target key end

     0   :  { %s861_s0 = inlined_call_operand.vmem [shape: f32[16,256], index: 0, kind: input, shape index: {}]   ;;  %s862_s1 = inlined_call_operand.vmem [shape: f32[256,64], index: 1, kind: input, shape index: {}]   ;;  %s863_s2 = inlined_call_operand.vmem [shape: f32[1,64], index: 2, kind: input, shape index: {}]   ;;  %s864_s3 = inlined_call_operand.vmem [shape: f32[1,64], index: 3, kind: input, shape index: {}]   ;;  %s865_s4 = inlined_call_operand.vmem [shape: f32[1,64], index: 4, kind: input, shape index: {}]   ;;  %s866_s5 = inlined_call_operand.vmem [shape: f32[64,16], index: 5, kind: input, shape index: {}]   ;;  %s867_s6 = inlined_call_operand.vmem [shape: f32[1,16], index: 6, kind: input, shape index: {}]   ;;  %s868_s7 = inlined_call_operand.vmem [shape: f32[1,16], index: 7, kind: input, shape index: {}]   ;;  %s869_s8 = inlined_call_operand.vmem [shape: f32[1,16], index: 8, kind: input, shape index: {}]   ;;  %s870_s9 = inlined_call_operand.vmem [shape: f32[16,128], index: 9, kind: input, shape index: {}]   ;;  %s871_s10 = inlined_call_operand.vmem [shape: f32[1,128], index: 10, kind: input, shape index: {}]   ;;  %s872_s11 = inlined_call_operand.hbm [shape: f32[16,128], index: 11, kind: output, shape index: {}]  }
   0x1   :  { %v58_v0 = vld [vmem:[%s862_s1 + $0x78] sm:$0xff]  ;;  %v57_v1 = vld [vmem:[%s862_s1 + $0x70] sm:$0xff]  ;;  %v56_v4 = vld [vmem:[%s862_s1 + $0x68] sm:$0xff] }
   0x2   :  { %v74_v2 = vld [vmem:[%s862_s1 + $0xf8] sm:$0xff]  ;;  %79 = vmatpush.msra.mxu0 %v58_v0  ;;  %v73_v3 = vld [vmem:[%s862_s1 + $0xf0] sm:$0xff]  ;;  %v72_v5 = vld [vmem:[%s862_s1 + $0xe8] sm:$0xff] }
   0x3   :  { %102 = vmatpush.msra.mxu1 %v74_v2  ;;  %v55_v6 = vld [vmem:[%s862_s1 + $0x60] sm:$0xff]  ;;  %v54_v8 = vld [vmem:[%s862_s1 + $0x58] sm:$0xff]  ;;  %v53_v10 = vld [vmem:[%s862_s1 + $0x50] sm:$0xff] }
   0x4   :  { %80 = vmatpush.msra.mxu0 %v57_v1  ;;  %v71_v7 = vld [vmem:[%s862_s1 + $0xe0] sm:$0xff]  ;;  %v70_v9 = vld [vmem:[%s862_s1 + $0xd8] sm:$0xff]  ;;  %v69_v11 = vld [vmem:[%s862_s1 + $0xd0] sm:$0xff] }
   0x5   :  { %103 = vmatpush.msra.mxu1 %v73_v3  ;;  %v52_v12 = vld [vmem:[%s862_s1 + $0x48] sm:$0xff]  ;;  %v51_v14 = vld [vmem:[%s862_s1 + $0x40] sm:$0xff]  ;;  %v50_v16 = vld [vmem:[%s862_s1 + $0x38] sm:$0xff] }
   0x6   :  { %81 = vmatpush.msra.mxu0 %v56_v4  ;;  %v68_v13 = vld [vmem:[%s862_s1 + $0xc8] sm:$0xff]  ;;  %v67_v15 = vld [vmem:[%s862_s1 + $0xc0] sm:$0xff]  ;;  %v66_v17 = vld [vmem:[%s862_s1 + $0xb8] sm:$0xff] }
   0x7   :  { %104 = vmatpush.msra.mxu1 %v72_v5 }
   0x8   :  { %82 = vmatpush.msra.mxu0 %v55_v6 }
   0x9   :  { %105 = vmatpush.msra.mxu1 %v71_v7 }
   0xa   :  { %83 = vmatpush.msra.mxu0 %v54_v8 }
   0xb   :  { %106 = vmatpush.msra.mxu1 %v70_v9 }
   0xc   :  { %84 = vmatpush.msra.mxu0 %v53_v10 }
   0xd   :  { %107 = vmatpush.msra.mxu1 %v69_v11 }
   0xe   :  { %85 = vmatpush.msra.mxu0 %v52_v12 }
   0xf   :  { %108 = vmatpush.msra.mxu1 %v68_v13 }
  0x10   :  { %16 = vsyncpa [#allocation3], 0  ;;  %86 = vmatpush.msra.mxu0 %v51_v14  ;;  %v49_v18 = vld [vmem:[%s862_s1 + $0x30] sm:$0xff]  ;;  %v48_v20 = vld [vmem:[%s862_s1 + $0x28] sm:$0xff]  ;;  %vm127_vm0 = vcmask 523264   ;;  %v591_v47 = vmov 64.0  }
  0x11   :  { %109 = vmatpush.msra.mxu1 %v67_v15  ;;  %v65_v19 = vld [vmem:[%s862_s1 + $0xb0] sm:$0xff]  ;;  %v64_v21 = vld [vmem:[%s862_s1 + $0xa8] sm:$0xff]  ;;  %v47_v22 = vld [vmem:[%s862_s1 + $0x20] sm:$0xff]  ;;  %545 = vrcp.f32 %v591_v47  ;;  %s593_s15 = smov [#allocation2]   ;;  %s513_s19 = sshll.u32 %s872_s11, 4  ;;  %s514_s19 = int_to_ptr.hbm [resolvable:$true] %s513_s19 }
  0x12   :  { %87 = vmatpush.msra.mxu0 %v50_v16  ;;  %v63_v23 = vld [vmem:[%s862_s1 + $0xa0] sm:$0xff]  ;;  %v46_v24 = vld [vmem:[%s862_s1 + $0x18] sm:$0xff]  ;;  %v45_v26 = vld [vmem:[%s862_s1 + $0x10] sm:$0xff]  ;;  %s511_s16 = sshll.u32 %s593_s15, 4  ;;  %s594_s20 = smov 128   ;;  %s512_s16 = int_to_ptr.vmem [resolvable:$true] %s511_s16 }
  0x13   :  { %110 = vmatpush.msra.mxu1 %v66_v17  ;;  %v62_v25 = vld [vmem:[%s862_s1 + $0x98] sm:$0xff]  ;;  %v61_v27 = vld [vmem:[%s862_s1 + $0x90] sm:$0xff]  ;;  %v44_v28 = vld [vmem:[%s862_s1 + $0x8] sm:$0xff]  ;;  %s595_s21 = smov 8  }
  0x14   :  { %88 = vmatpush.msra.mxu0 %v49_v18  ;;  %v60_v29 = vld [vmem:[%s862_s1 + $0x88] sm:$0xff]  ;;  %v43_v30 = vld [vmem:[%s862_s1] sm:$0xff]  ;;  %v41_v34 = vld [vmem:[%s861_s0 + $0x10] sm:$0xff] }
  0x15   :  { %111 = vmatpush.msra.mxu1 %v65_v19  ;;  %v59_v31 = vld [vmem:[%s862_s1 + $0x80] sm:$0xff]  ;;  %v40_v33 = vld [vmem:[%s861_s0 + $0x8] sm:$0xff]  ;;  %v42_v35 = vld [vmem:[%s861_s0 + $0x18] sm:$0xff] }
  0x16   :  { %89 = vmatpush.msra.mxu0 %v48_v20  ;;  %v39_v32 = vld [vmem:[%s861_s0] sm:$0xff]  ;;  %v284_v0 = vld [vmem:[%s866_s5 + $0x38] sm:$0xff]  ;;  %v283_v1 = vld [vmem:[%s866_s5 + $0x30] sm:$0xff] }
  0x17   :  { %112 = vmatpush.msra.mxu1 %v64_v21  ;;  %v538_v36 = vld [vmem:[%s863_s2] ss:$0 sm:$0xff]  ;;  %v546_v48 = vpop.eup %545  ;;  %303 = vmatpush.msra.mxu2 %v284_v0  ;;  %v282_v4 = vld [vmem:[%s866_s5 + $0x28] sm:$0xff]  ;;  %v280_v7 = vld [vmem:[%s866_s5 + $0x18] sm:$0xff] }
  0x18   :  { %90 = vmatpush.msra.mxu0 %v47_v22  ;;  %v135_v49 = vmul.f32 64.0, %v546_v48  ;;  %vm139_vm1 = vweird.f32 %v546_v48  ;;  %v281_v6 = vld [vmem:[%s866_s5 + $0x20] sm:$0xff]  ;;  %v279_v8 = vld [vmem:[%s866_s5 + $0x10] sm:$0xff]  ;;  %v278_v11 = vld [vmem:[%s866_s5 + $0x8] sm:$0xff] }
  0x19   :  { %113 = vmatpush.msra.mxu1 %v63_v23  ;;  %304 = vmatpush.msra.mxu2 %v283_v1  ;;  %v277_v14 = vld [vmem:[%s866_s5] sm:$0xff] }
  0x1a   :  { %91 = vmatpush.msra.mxu0 %v46_v24  ;;  %v136_v50 = vsub.f32 1.0, %v135_v49  ;;  %v539_v22 = vld [vmem:[%s864_s3] ss:$0 sm:$0xff] }
  0x1b   :  { %114 = vmatpush.msra.mxu1 %v62_v25  ;;  %305 = vmatpush.msra.mxu2 %v282_v4 }
  0x1c   :  { %92 = vmatpush.msra.mxu0 %v45_v26  ;;  %v137_v51 = vmul.f32 %v546_v48, %v136_v50  ;;  %v540_v26 = vld [vmem:[%s865_s4] ss:$0 sm:$0xff] }
  0x1d   :  { %115 = vmatpush.msra.mxu1 %v61_v27  ;;  %306 = vmatpush.msra.mxu2 %v281_v6 }
  0x1e   :  { %93 = vmatpush.msra.mxu0 %v44_v28  ;;  %v138_v52 = vadd.f32 %v546_v48, %v137_v51 }
  0x1f   :  { %116 = vmatpush.msra.mxu1 %v60_v29  ;;  %307 = vmatpush.msra.mxu2 %v280_v7 }
  0x20   :  { %94 = vmatpush.msra.mxu0 %v43_v30  ;;  %v140_v53 = vsel %vm139_vm1, %v546_v48, %v138_v52  ;;  %vm320_vm1 = vcmask 130048  }
  0x21   :  { %117 = vmatpush.msra.mxu1 %v59_v31  ;;  %95 = vmatmul.f32.vlgmr.msra.gmra.mxu0 %v39_v32 }
  0x22   :  { %118 = vmatmul.f32.vlgmr.msra.gmra.mxu1 %v40_v33  ;;  %308 = vmatpush.msra.mxu2 %v279_v8 }
  0x24   :  { %309 = vmatpush.msra.mxu2 %v278_v11 }
  0x26   :  { %310 = vmatpush.msra.mxu2 %v277_v14 }
  0x29   :  { %98 = vmatmul.f32.gmra.mxu0 %v41_v34 }
  0x2a   :  { %121 = vmatmul.f32.gmra.mxu1 %v42_v35 }
  0x9e   :  { %v96_v37 = vpop.f32.mrf.mxu0 }
  0x9f   :  { %v119_v38 = vpop.f32.mrf.mxu1  ;;  %v97_v39 = vadd.f32 %v538_v36, %v96_v37 }
  0xa1   :  { %v120_v40 = vadd.f32 %v119_v38, %v97_v39 }
  0xa3   :  { %v128_v41 = vsel %vm127_vm0, %v120_v40, 0.0 }
  0xa4   :  { %129 = vadd.xlane.f32.xlu0 %v128_v41 }
  0xa6   :  { %v99_v42 = vpop.f32.mrf.mxu0 }
  0xa7   :  { %v122_v43 = vpop.f32.mrf.mxu1  ;;  %v100_v44 = vadd.f32 %v538_v36, %v99_v42 }
  0xa9   :  { %v123_v45 = vadd.f32 %v122_v43, %v100_v44 }
  0xab   :  { %v131_v46 = vsel %vm127_vm0, %v123_v45, 0.0 }
  0xac   :  { %132 = vadd.xlane.f32.xlu0 %v131_v46 }
 0x117   :  { %v130_v54 = vpop.xlane.xlu0 %129 }
 0x118   :  { %v141_v55 = vmul.f32 %v140_v53, %v130_v54 }
 0x11a   :  { %v143_v56 = vsub.f32 %v120_v40, %v141_v55 }
 0x11c   :  { %v145_v57 = vmul.f32 %v143_v56, %v143_v56 }
 0x11e   :  { %v147_v58 = vsel %vm127_vm0, %v145_v57, 0.0 }
 0x11f   :  { %148 = vadd.xlane.f32.xlu1 %v147_v58  ;;  %v133_v59 = vpop.xlane.xlu0 %132 }
 0x120   :  { %v142_v60 = vmul.f32 %v140_v53, %v133_v59 }
 0x122   :  { %v144_v61 = vsub.f32 %v123_v45, %v142_v60 }
 0x124   :  { %v146_v62 = vmul.f32 %v144_v61, %v144_v61 }
 0x126   :  { %v150_v63 = vsel %vm127_vm0, %v146_v62, 0.0 }
 0x127   :  { %151 = vadd.xlane.f32.xlu1 %v150_v63 }
 0x192   :  { %v149_v2 = vpop.xlane.xlu1 %148 }
 0x193   :  { %v153_v3 = vmul.f32 %v149_v2, %v140_v53 }
 0x195   :  { %v155_v5 = vadd.f32 1e-05, %v153_v3 }
 0x197   :  { %547 = vrsqrt.f32 %v155_v5  ;;  %vm163_vm3 = vweird.f32 %v155_v5 }
 0x19a   :  { %v152_v9 = vpop.xlane.xlu1 %151 }
 0x19b   :  { %v154_v10 = vmul.f32 %v152_v9, %v140_v53 }
 0x19d   :  { %v548_v12 = vpop.eup %547  ;;  %v156_v13 = vadd.f32 1e-05, %v154_v10 }
 0x19e   :  { %v158_v15 = vmul.f32 %v548_v12, %v155_v5  ;;  %vm164_vm2 = vweird.f32 %v548_v12 }
 0x19f   :  { %549 = vrsqrt.f32 %v156_v13  ;;  %vm165_vm4 = vmor %vm163_vm3, %vm164_vm2  ;;  %vm173_vm6 = vweird.f32 %v156_v13 }
 0x1a0   :  { %v159_v16 = vmul.f32 %v548_v12, %v158_v15 }
 0x1a2   :  { %v160_v17 = vmul.f32 0.5, %v159_v16 }
 0x1a4   :  { %v161_v18 = vsub.f32 1.5, %v160_v17 }
 0x1a5   :  { %v550_v19 = vpop.eup %549 }
 0x1a6   :  { %v162_v20 = vmul.f32 %v548_v12, %v161_v18  ;;  %v168_v21 = vmul.f32 %v550_v19, %v156_v13  ;;  %vm174_vm5 = vweird.f32 %v550_v19 }
 0x1a7   :  { %vm175_vm7 = vmor %vm173_vm6, %vm174_vm5 }
 0x1a8   :  { %v166_v23 = vsel %vm165_vm4, %v548_v12, %v162_v20  ;;  %v169_v24 = vmul.f32 %v550_v19, %v168_v21 }
 0x1a9   :  { %v177_v25 = vmul.f32 %v166_v23, %v143_v56 }
 0x1aa   :  { %v170_v27 = vmul.f32 0.5, %v169_v24 }
 0x1ab   :  { %v182_v28 = vmul.f32 %v539_v22, %v177_v25 }
 0x1ac   :  { %v171_v29 = vsub.f32 1.5, %v170_v27 }
 0x1ad   :  { %v801_v30 = vadd.f32 %v540_v26, %v182_v28 }
 0x1ae   :  { %v172_v31 = vmul.f32 %v550_v19, %v171_v29 }
 0x1af   :  { %v191_v32 = vmul.f32 0.70710677, %v801_v30 }
 0x1b0   :  { %v176_v33 = vsel %vm175_vm7, %v550_v19, %v172_v31 }
 0x1b1   :  { %v178_v34 = vmul.f32 %v176_v33, %v144_v61  ;;  %v193_v35 = vmul.f32 %v191_v32, %v191_v32 }
 0x1b3   :  { %v194_v36 = vmin.f32 %v193_v35, 16.0  ;;  %v183_v37 = vmul.f32 %v539_v22, %v178_v34 }
 0x1b5   :  { %v195_v38 = vmul.f32 2.1237322e-06, %v194_v36  ;;  %v206_v39 = vmul.f32 3.8918573e-05, %v194_v36  ;;  %v804_v40 = vadd.f32 %v540_v26, %v183_v37 }
 0x1b7   :  { %v196_v41 = vadd.f32 0.00028619796, %v195_v38  ;;  %v207_v42 = vadd.f32 0.001143296, %v206_v39  ;;  %v807_v43 = vmul.f32 0.70710677, %v804_v40 }
 0x1b8   :  { %v189_v39 = vmul.f32 0.5, %v801_v30  ;;  %v541_v30 = vld [vmem:[%s867_s6] ss:$0 sm:$0xff] }
 0x1b9   :  { %v197_v44 = vmul.f32 %v196_v41, %v194_v36  ;;  %v208_v45 = vmul.f32 %v207_v42, %v194_v36  ;;  %v233_v46 = vmul.f32 %v807_v43, %v807_v43 }
 0x1bb   :  { %v209_v47 = vadd.f32 0.014752088, %v208_v45  ;;  %v198_v48 = vadd.f32 0.0036580483, %v197_v44  ;;  %v234_v49 = vmin.f32 %v233_v46, 16.0 }
 0x1bd   :  { %v210_v50 = vmul.f32 %v209_v47, %v194_v36  ;;  %v235_v51 = vmul.f32 2.1237322e-06, %v234_v49  ;;  %v246_v52 = vmul.f32 3.8918573e-05, %v234_v49  ;;  %v199_v54 = vmul.f32 %v198_v48, %v194_v36 }
 0x1bf   :  { %v211_v53 = vadd.f32 0.112945676, %v210_v50  ;;  %v236_v55 = vadd.f32 0.00028619796, %v235_v51  ;;  %v247_v56 = vadd.f32 0.001143296, %v246_v52 }
 0x1c0   :  { %v200_v61 = vadd.f32 0.05243302, %v199_v54  ;;  %v190_v50 = vmul.f32 0.5, %v804_v40  ;;  %v592_v40 = vmov 16.0  }
 0x1c1   :  { %v212_v57 = vmul.f32 %v211_v53, %v194_v36  ;;  %v237_v58 = vmul.f32 %v236_v55, %v234_v49  ;;  %v248_v59 = vmul.f32 %v247_v56, %v234_v49 }
 0x1c2   :  { %v201_v3 = vmul.f32 %v200_v61, %v194_v36 }
 0x1c3   :  { %v213_v60 = vadd.f32 0.4994258, %v212_v57  ;;  %v249_v62 = vadd.f32 0.014752088, %v248_v59  ;;  %v238_v0 = vadd.f32 0.0036580483, %v237_v58 }
 0x1c4   :  { %v202_v7 = vadd.f32 0.18741608, %v201_v3 }
 0x1c5   :  { %v214_v63 = vmul.f32 %v213_v60, %v194_v36  ;;  %v250_v1 = vmul.f32 %v249_v62, %v234_v49  ;;  %v239_v5 = vmul.f32 %v238_v0, %v234_v49 }
 0x1c6   :  { %v203_v12 = vmul.f32 %v202_v7, %v194_v36 }
 0x1c7   :  { %v215_v2 = vadd.f32 1.0, %v214_v63  ;;  %v251_v4 = vadd.f32 0.112945676, %v250_v1  ;;  %v240_v9 = vadd.f32 0.05243302, %v239_v5 }
 0x1c8   :  { %v204_v18 = vadd.f32 1.1283791, %v203_v12  ;;  %v470_v12 = vld [vmem:[%s870_s9] sm:$0xff] }
 0x1c9   :  { %551 = vrcp.f32 %v215_v2  ;;  %v252_v6 = vmul.f32 %v251_v4, %v234_v49  ;;  %v241_v15 = vmul.f32 %v240_v9, %v234_v49  ;;  %v227_v17 = vand.u32 2147483648, %v215_v2 }
 0x1ca   :  { %v225_v20 = vand.u32 2147483647, %v215_v2  ;;  %vm221_vm9 = vweird.f32 %v215_v2  ;;  %v205_v25 = vmul.f32 %v204_v18, %v191_v32 }
 0x1cb   :  { %v253_v8 = vadd.f32 0.4994258, %v252_v6  ;;  %v242_v21 = vadd.f32 0.18741608, %v241_v15  ;;  %v228_v23 = vor.u32 1.1754944e-38, %v227_v17 }
 0x1cc   :  { %vm226_vm11 = vcmp.eq.f32.partialorder %v225_v20, 8.507059e+37 }
 0x1cd   :  { %v254_v10 = vmul.f32 %v253_v8, %v234_v49  ;;  %v243_v28 = vmul.f32 %v242_v21, %v234_v49 }
 0x1cf   :  { %v552_v11 = vpop.eup %551  ;;  %v255_v14 = vadd.f32 1.0, %v254_v10  ;;  %v244_v36 = vadd.f32 1.1283791, %v243_v28 }
 0x1d0   :  { %v217_v13 = vmul.f32 %v552_v11, %v215_v2  ;;  %vm222_vm8 = vweird.f32 %v552_v11 }
 0x1d1   :  { %553 = vrcp.f32 %v255_v14  ;;  %vm223_vm10 = vmor %vm221_vm9, %vm222_vm8  ;;  %v267_v35 = vand.u32 2147483648, %v255_v14  ;;  %v265_v38 = vand.u32 2147483647, %v255_v14  ;;  %vm261_vm13 = vweird.f32 %v255_v14 }
 0x1d2   :  { %v218_v16 = vsub.f32 1.0, %v217_v13  ;;  %v245_v45 = vmul.f32 %v244_v36, %v807_v43  ;;  %555 = vrcp.f32 %v592_v40 }
 0x1d3   :  { %v268_v32 = vor.u32 1.1754944e-38, %v267_v35  ;;  %vm266_vm15 = vcmp.eq.f32.partialorder %v265_v38, 8.507059e+37 }
 0x1d4   :  { %v219_v19 = vmul.f32 %v552_v11, %v218_v16 }
 0x1d6   :  { %v220_v22 = vadd.f32 %v552_v11, %v219_v19 }
 0x1d7   :  { %v554_v24 = vpop.eup %553 }
 0x1d8   :  { %v224_v26 = vsel %vm223_vm10, %v552_v11, %v220_v22  ;;  %v257_v29 = vmul.f32 %v554_v24, %v255_v14  ;;  %vm262_vm12 = vweird.f32 %v554_v24  ;;  %v556_v58 = vpop.eup %555  ;;  %v471_v11 = vld [vmem:[%s870_s9 + $0x8] sm:$0xff] }
 0x1d9   :  { %v229_v27 = vsel %vm226_vm11, %v228_v23, %v224_v26  ;;  %vm263_vm14 = vmor %vm261_vm13, %vm262_vm12  ;;  %v328_v59 = vmul.f32 16.0, %v556_v58  ;;  %496 = vmatpush.msra.mxu3 %v471_v11  ;;  %v542_v26 = vld [vmem:[%s868_s7] ss:$0 sm:$0xff] }
 0x1da   :  { %v230_v31 = vmul.f32 %v229_v27, %v205_v25  ;;  %v258_v33 = vsub.f32 1.0, %v257_v29 }
 0x1db   :  { %v329_v60 = vsub.f32 1.0, %v328_v59  ;;  %497 = vmatpush.msra.mxu3 %v470_v12 }
 0x1dc   :  { %v525_v34 = vclamps-f32 %v230_v31, 1.0  ;;  %v259_v37 = vmul.f32 %v554_v24, %v258_v33  ;;  %v543_v31 = vld [vmem:[%s869_s8] ss:$0 sm:$0xff] }
 0x1dd   :  { %v330_v61 = vmul.f32 %v556_v58, %v329_v60 }
 0x1de   :  { %v273_v41 = vadd.f32 1.0, %v525_v34  ;;  %v260_v42 = vadd.f32 %v554_v24, %v259_v37 }
 0x1df   :  { %v331_v62 = vadd.f32 %v556_v58, %v330_v61 }
 0x1e0   :  { %v275_v44 = vmul.f32 %v273_v41, %v189_v39  ;;  %v264_v46 = vsel %vm263_vm14, %v554_v24, %v260_v42 }
 0x1e1   :  { %v269_v47 = vsel %vm266_vm15, %v268_v32, %v264_v46 }
 0x1e2   :  { %527 = vmatmul.msk.f32.vlgmr.msra.gmra.mxu2 %vm127_vm0, %v275_v44  ;;  %v270_v48 = vmul.f32 %v269_v47, %v245_v45 }
 0x1e4   :  { %v526_v49 = vclamps-f32 %v270_v48, 1.0 }
 0x1e6   :  { %v274_v51 = vadd.f32 1.0, %v526_v49 }
 0x1e8   :  { %v276_v52 = vmul.f32 %v274_v51, %v190_v50 }
 0x1ea   :  { %528 = vmatmul.msk.f32.gmra.mxu2 %vm127_vm0, %v276_v52  ;;  %vm332_vm0 = vweird.f32 %v556_v58 }
 0x1eb   :  { %v333_v63 = vsel %vm332_vm0, %v556_v58, %v331_v62 }
 0x265   :  { %v312_v53 = vpop.f32.mrf.mxu2 }
 0x266   :  { %v313_v43 = vadd.f32 %v541_v30, %v312_v53 }
 0x268   :  { %v321_v54 = vsel %vm320_vm1, %v313_v43, 0.0 }
 0x269   :  { %322 = vadd.xlane.f32.xlu2 %v321_v54 }
 0x26d   :  { %v315_v55 = vpop.f32.mrf.mxu2 }
 0x26e   :  { %v316_v56 = vadd.f32 %v541_v30, %v315_v55 }
 0x270   :  { %v324_v57 = vsel %vm320_vm1, %v316_v56, 0.0 }
 0x271   :  { %325 = vadd.xlane.f32.xlu2 %v324_v57 }
 0x2dc   :  { %v323_v0 = vpop.xlane.xlu2 %322 }
 0x2dd   :  { %v334_v1 = vmul.f32 %v333_v63, %v323_v0 }
 0x2df   :  { %v336_v2 = vsub.f32 %v313_v43, %v334_v1 }
 0x2e1   :  { %v338_v3 = vmul.f32 %v336_v2, %v336_v2 }
 0x2e3   :  { %v340_v4 = vsel %vm320_vm1, %v338_v3, 0.0 }
 0x2e4   :  { %341 = vadd.xlane.f32.xlu0 %v340_v4  ;;  %v326_v5 = vpop.xlane.xlu2 %325 }
 0x2e5   :  { %v335_v6 = vmul.f32 %v333_v63, %v326_v5 }
 0x2e7   :  { %v337_v7 = vsub.f32 %v316_v56, %v335_v6 }
 0x2e9   :  { %v339_v8 = vmul.f32 %v337_v7, %v337_v7 }
 0x2eb   :  { %v343_v9 = vsel %vm320_vm1, %v339_v8, 0.0 }
 0x2ec   :  { %344 = vadd.xlane.f32.xlu1 %v343_v9 }
 0x357   :  { %v342_v10 = vpop.xlane.xlu0 %341 }
 0x358   :  { %v346_v13 = vmul.f32 %v342_v10, %v333_v63 }
 0x35a   :  { %v348_v14 = vadd.f32 1e-05, %v346_v13 }
 0x35c   :  { %557 = vrsqrt.f32 %v348_v14  ;;  %vm356_vm3 = vweird.f32 %v348_v14 }
 0x35f   :  { %v345_v15 = vpop.xlane.xlu1 %344 }
 0x360   :  { %v347_v16 = vmul.f32 %v345_v15, %v333_v63 }
 0x362   :  { %v558_v17 = vpop.eup %557  ;;  %v349_v19 = vadd.f32 1e-05, %v347_v16 }
 0x363   :  { %v351_v18 = vmul.f32 %v558_v17, %v348_v14  ;;  %vm357_vm2 = vweird.f32 %v558_v17 }
 0x364   :  { %559 = vrsqrt.f32 %v349_v19  ;;  %vm358_vm4 = vmor %vm356_vm3, %vm357_vm2  ;;  %vm366_vm6 = vweird.f32 %v349_v19 }
 0x365   :  { %v352_v20 = vmul.f32 %v558_v17, %v351_v18 }
 0x367   :  { %v353_v21 = vmul.f32 0.5, %v352_v20 }
 0x369   :  { %v354_v22 = vsub.f32 1.5, %v353_v21 }
 0x36a   :  { %v560_v23 = vpop.eup %559 }
 0x36b   :  { %v355_v24 = vmul.f32 %v558_v17, %v354_v22  ;;  %v361_v25 = vmul.f32 %v560_v23, %v349_v19  ;;  %vm367_vm5 = vweird.f32 %v560_v23 }
 0x36c   :  { %vm368_vm7 = vmor %vm366_vm6, %vm367_vm5 }
 0x36d   :  { %v359_v27 = vsel %vm358_vm4, %v558_v17, %v355_v24  ;;  %v362_v29 = vmul.f32 %v560_v23, %v361_v25 }
 0x36e   :  { %v370_v28 = vmul.f32 %v359_v27, %v336_v2 }
 0x36f   :  { %v363_v33 = vmul.f32 0.5, %v362_v29 }
 0x370   :  { %v375_v34 = vmul.f32 %v542_v26, %v370_v28 }
 0x371   :  { %v364_v35 = vsub.f32 1.5, %v363_v33 }
 0x372   :  { %v835_v36 = vadd.f32 %v543_v31, %v375_v34 }
 0x373   :  { %v365_v37 = vmul.f32 %v560_v23, %v364_v35 }
 0x374   :  { %v838_v38 = vmul.f32 0.70710677, %v835_v36 }
 0x375   :  { %v369_v39 = vsel %vm368_vm7, %v560_v23, %v365_v37 }
 0x376   :  { %v386_v41 = vmul.f32 %v838_v38, %v838_v38  ;;  %v371_v42 = vmul.f32 %v369_v39, %v337_v7 }
 0x378   :  { %v387_v44 = vmin.f32 %v386_v41, 16.0  ;;  %v376_v32 = vmul.f32 %v542_v26, %v371_v42 }
 0x37a   :  { %v388_v45 = vmul.f32 2.1237322e-06, %v387_v44  ;;  %v399_v46 = vmul.f32 3.8918573e-05, %v387_v44  ;;  %v842_v47 = vadd.f32 %v543_v31, %v376_v32 }
 0x37c   :  { %v389_v48 = vadd.f32 0.00028619796, %v388_v45  ;;  %v400_v49 = vadd.f32 0.001143296, %v399_v46  ;;  %v845_v50 = vmul.f32 0.70710677, %v842_v47 }
 0x37d   :  { %v382_v46 = vmul.f32 0.5, %v835_v36  ;;  %v544_v36 = vld [vmem:[%s871_s10] ss:$0 sm:$0xff] }
 0x37e   :  { %v390_v51 = vmul.f32 %v389_v48, %v387_v44  ;;  %v401_v52 = vmul.f32 %v400_v49, %v387_v44  ;;  %v426_v30 = vmul.f32 %v845_v50, %v845_v50 }
 0x380   :  { %v402_v53 = vadd.f32 0.014752088, %v401_v52  ;;  %v391_v43 = vadd.f32 0.0036580483, %v390_v51  ;;  %v427_v54 = vmin.f32 %v426_v30, 16.0 }
 0x382   :  { %v403_v55 = vmul.f32 %v402_v53, %v387_v44  ;;  %v428_v56 = vmul.f32 2.1237322e-06, %v427_v54  ;;  %v439_v57 = vmul.f32 3.8918573e-05, %v427_v54  ;;  %v392_v58 = vmul.f32 %v391_v43, %v387_v44 }
 0x384   :  { %v404_v40 = vadd.f32 0.112945676, %v403_v55  ;;  %v429_v59 = vadd.f32 0.00028619796, %v428_v56  ;;  %v440_v60 = vadd.f32 0.001143296, %v439_v57 }
 0x385   :  { %v393_v1 = vadd.f32 0.05243302, %v392_v58  ;;  %v383_v55 = vmul.f32 0.5, %v842_v47 }
 0x386   :  { %v405_v61 = vmul.f32 %v404_v40, %v387_v44  ;;  %v430_v62 = vmul.f32 %v429_v59, %v427_v54  ;;  %v441_v63 = vmul.f32 %v440_v60, %v427_v54 }
 0x387   :  { %v394_v7 = vmul.f32 %v393_v1, %v387_v44 }
 0x388   :  { %v406_v0 = vadd.f32 0.4994258, %v405_v61  ;;  %v442_v2 = vadd.f32 0.014752088, %v441_v63  ;;  %v431_v4 = vadd.f32 0.0036580483, %v430_v62 }
 0x389   :  { %v395_v11 = vadd.f32 0.18741608, %v394_v7 }
 0x38a   :  { %v407_v3 = vmul.f32 %v406_v0, %v387_v44  ;;  %v443_v5 = vmul.f32 %v442_v2, %v427_v54  ;;  %v432_v9 = vmul.f32 %v431_v4, %v427_v54 }
 0x38b   :  { %v396_v16 = vmul.f32 %v395_v11, %v387_v44 }
 0x38c   :  { %v408_v6 = vadd.f32 1.0, %v407_v3  ;;  %v444_v8 = vadd.f32 0.112945676, %v443_v5  ;;  %v433_v13 = vadd.f32 0.05243302, %v432_v9 }
 0x38d   :  { %v397_v22 = vadd.f32 1.1283791, %v396_v16 }
 0x38e   :  { %561 = vrcp.f32 %v408_v6  ;;  %v445_v10 = vmul.f32 %v444_v8, %v427_v54  ;;  %v434_v19 = vmul.f32 %v433_v13, %v427_v54  ;;  %v420_v21 = vand.u32 2147483648, %v408_v6 }
 0x38f   :  { %v418_v24 = vand.u32 2147483647, %v408_v6  ;;  %vm414_vm9 = vweird.f32 %v408_v6  ;;  %v398_v29 = vmul.f32 %v397_v22, %v838_v38 }
 0x390   :  { %v446_v12 = vadd.f32 0.4994258, %v445_v10  ;;  %v435_v25 = vadd.f32 0.18741608, %v434_v19  ;;  %v421_v27 = vor.u32 1.1754944e-38, %v420_v21 }
 0x391   :  { %vm419_vm11 = vcmp.eq.f32.partialorder %v418_v24, 8.507059e+37 }
 0x392   :  { %v447_v14 = vmul.f32 %v446_v12, %v427_v54  ;;  %v436_v34 = vmul.f32 %v435_v25, %v427_v54 }
 0x394   :  { %v562_v15 = vpop.eup %561  ;;  %v448_v18 = vadd.f32 1.0, %v447_v14  ;;  %v437_v44 = vadd.f32 1.1283791, %v436_v34 }
 0x395   :  { %v410_v17 = vmul.f32 %v562_v15, %v408_v6  ;;  %vm415_vm8 = vweird.f32 %v562_v15 }
 0x396   :  { %563 = vrcp.f32 %v448_v18  ;;  %vm416_vm10 = vmor %vm414_vm9, %vm415_vm8  ;;  %v460_v42 = vand.u32 2147483648, %v448_v18  ;;  %v458_v45 = vand.u32 2147483647, %v448_v18  ;;  %vm454_vm13 = vweird.f32 %v448_v18 }
 0x397   :  { %v411_v20 = vsub.f32 1.0, %v410_v17  ;;  %v438_v52 = vmul.f32 %v437_v44, %v845_v50 }
 0x398   :  { %v461_v38 = vor.u32 1.1754944e-38, %v460_v42  ;;  %vm459_vm15 = vcmp.eq.f32.partialorder %v458_v45, 8.507059e+37 }
 0x399   :  { %v412_v23 = vmul.f32 %v562_v15, %v411_v20 }
 0x39b   :  { %v413_v26 = vadd.f32 %v562_v15, %v412_v23 }
 0x39c   :  { %v564_v28 = vpop.eup %563 }
 0x39d   :  { %v417_v31 = vsel %vm416_vm10, %v562_v15, %v413_v26  ;;  %v450_v35 = vmul.f32 %v564_v28, %v448_v18  ;;  %vm455_vm12 = vweird.f32 %v564_v28 }
 0x39e   :  { %v422_v33 = vsel %vm419_vm11, %v421_v27, %v417_v31  ;;  %vm456_vm14 = vmor %vm454_vm13, %vm455_vm12 }
 0x39f   :  { %v423_v37 = vmul.f32 %v422_v33, %v398_v29  ;;  %v451_v39 = vsub.f32 1.0, %v450_v35 }
 0x3a1   :  { %v529_v41 = vclamps-f32 %v423_v37, 1.0  ;;  %v452_v32 = vmul.f32 %v564_v28, %v451_v39 }
 0x3a3   :  { %v466_v48 = vadd.f32 1.0, %v529_v41  ;;  %v453_v49 = vadd.f32 %v564_v28, %v452_v32 }
 0x3a5   :  { %v468_v51 = vmul.f32 %v466_v48, %v382_v46  ;;  %v457_v30 = vsel %vm456_vm14, %v564_v28, %v453_v49 }
 0x3a6   :  { %v462_v53 = vsel %vm459_vm15, %v461_v38, %v457_v30 }
 0x3a7   :  { %531 = vmatmul.msk.f32.vlgmr.msra.gmra.mxu3 %vm320_vm1, %v468_v51  ;;  %v463_v43 = vmul.f32 %v462_v53, %v438_v52 }
 0x3a9   :  { %v530_v54 = vclamps-f32 %v463_v43, 1.0 }
 0x3ab   :  { %v467_v56 = vadd.f32 1.0, %v530_v54 }
 0x3ad   :  { %v469_v57 = vmul.f32 %v467_v56, %v383_v55 }
 0x3af   :  { %532 = vmatmul.msk.f32.gmra.mxu3 %vm320_vm1, %v469_v57 }
 0x42a   :  { %v499_v40 = vpop.f32.mrf.mxu3 }
 0x42b   :  { %v500_v58 = vadd.f32 %v544_v36, %v499_v40 }
 0x42d   :  { %505 = vst [vmem:[#allocation2] sm:$0xff] %v500_v58 }
 0x432   :  { %v502_v50 = vpop.f32.mrf.mxu3 }
 0x433   :  { %v503_v47 = vadd.f32 %v544_v36, %v502_v50 }
 0x435   :  { %506 = vst [vmem:[#allocation2 + $0x8] sm:$0xff] %v503_v47 }
 0x436   :  { %519 = dma.vmem_to_hbm [thread:$0]  %s512_s16, 256, %s514_s19, [#allocation3], %s594_s20, %s594_s20, %s595_s21  }
 0x437   :  { %589 = dma.done.wait [#allocation3], 256  }
 0x438   :  { %590 = vsyncadd [#allocation3], 4294967040 }
 0x439   :  { %524 = vsyncpa [#allocation3], 1 }

</bundles_post_ra>
